<compile_context>
chip_gen: v6e
topology: v6e:2x2x1
jax: 0.10.0
libtpu: 0.0.40
codegen_flags: <defaults>
</compile_context>

<pallas_src>
import jax
import jax.numpy as jnp
from jax.experimental import pallas as pl
from jax.experimental.pallas import tpu as pltpu


# ------------------------- fused Pallas kernel -------------------------

def fused_cnn_kernel(patchT_ref, wT_ref, b_ref, gamma_ref, beta_ref,
                     w12_ref, b12_ref, out_ref):
    # patchT_ref : [Kp, M]       M = N*H*W on lanes, Kp = padded C*KH*KW
    # wT_ref     : [F, Kp]
    # b/gamma/beta : [F, 1]
    # w12_ref    : [F, HW, classes]   fused (feature @ fc) weight, per filter
    # b12_ref    : [1, classes]
    # out_ref    : [N, classes]
    f_dim, hw, _ = w12_ref.shape
    n_img, _ = out_ref.shape

    # ---- conv as one GEMM on the MXU (lane-dense [F, M] slab) ----
    yT = jnp.dot(wT_ref[...], patchT_ref[...],
                 preferred_element_type=jnp.float32)            # [F, M]
    yT = jnp.maximum(yT + b_ref[...], 0.0)                      # bias + ReLU

    # ---- BatchNorm2d (training mode): per-channel stats over (N, H, W) ----
    mean = jnp.mean(yT, axis=1, keepdims=True)                  # [F, 1]
    ctr = yT - mean
    var = jnp.mean(ctr * ctr, axis=1, keepdims=True)            # biased variance
    ybnT = gamma_ref[...] * ctr * jax.lax.rsqrt(var + 1e-5) + beta_ref[...]

    # ---- fused (feature @ fc) linear, fully in-kernel ----
    # flat[n, f*HW + p] == ybnT[f, n*HW + p]  (PyTorch .view(N, C*H*W) order),
    # so logits[n] = b12 + sum_f ybnT[f, n*HW:(n+1)*HW] @ w12[f].
    # Slices are static and 128-lane aligned (HW = 256): no in-kernel relayout.
    rows = [b12_ref[...] for _ in range(n_img)]                 # each [1, classes]
    for f in range(f_dim):
        w_f = w12_ref[f]                                        # [HW, classes]
        for n in range(n_img):
            rows[n] = rows[n] + jnp.dot(
                ybnT[f:f + 1, n * hw:(n + 1) * hw], w_f,
                preferred_element_type=jnp.float32)

    # ---- softmax(dim=1), exact normalization ----
    for n in range(n_img):
        m = jnp.max(rows[n], axis=1, keepdims=True)
        e = jnp.exp(rows[n] - m)
        out_ref[n:n + 1, :] = e / jnp.sum(e, axis=1, keepdims=True)


# ------------------------- wrapper -------------------------

_VMEM_SPEC = pl.BlockSpec(memory_space=pltpu.MemorySpace.VMEM)
_CPARAMS = pltpu.CompilerParams(vmem_limit_bytes=32 * 1024 * 1024)


def fused_cnn(patchesT, prep, n_img):
    n_cls = prep["w12"].shape[-1]
    return pl.pallas_call(
        fused_cnn_kernel,
        out_shape=jax.ShapeDtypeStruct((n_img, n_cls), jnp.float32),
        in_specs=[_VMEM_SPEC] * 7,
        out_specs=_VMEM_SPEC,
        compiler_params=_CPARAMS,
    )(patchesT, prep["conv_wT"], prep["conv_b"], prep["bn_gamma"],
      prep["bn_beta"], prep["w12"], prep["b12"])


# ------------------------- glue: im2col + forward -------------------------

def im2col_T_3x3_pad1(x, k_pad):
    # x: [N, C, H, W] -> transposed patches [k_pad, N*H*W] in (c, kh, kw) row
    # order (matches conv_w.reshape(F, C*9)); sublane pad folded into the stack.
    N, C, H, W = x.shape
    xp = jnp.pad(x, ((0, 0), (0, 0), (1, 1), (1, 1)))
    rows = [xp[:, c, kh:kh + H, kw:kw + W]                       # each [N, H, W]
            for c in range(C) for kh in range(3) for kw in range(3)]
    rows += [jnp.zeros((N, H, W), x.dtype)] * (k_pad - C * 9)
    return jnp.stack(rows, axis=0).reshape(k_pad, N * H * W)


def prepare_params(params):
    """Offline weight prep (HIGHEST precision): fuse feat@fc, pad K, reshape."""
    hp = jax.lax.Precision.HIGHEST
    Fc, C, KH, KW = params["conv_w"].shape
    K = C * KH * KW
    Kp = ((K + 7) // 8) * 8                                      # 27 -> 32
    wT = jnp.pad(params["conv_w"].reshape(Fc, K), ((0, 0), (0, Kp - K)))
    flat, n_cls = params["feat_w"].shape[0], params["fc_w"].shape[1]
    hw = flat // Fc
    # No nonlinearity between the feature Linear and fc_block -> compose offline.
    w12 = jnp.dot(params["feat_w"], params["fc_w"], precision=hp)
    b12 = jnp.dot(params["feat_b"], params["fc_w"], precision=hp) + params["fc_b"]
    return {
        "conv_wT": wT,                                           # [Fc, Kp]
        "conv_b": params["conv_b"].reshape(Fc, 1),
        "bn_gamma": params["bn_gamma"].reshape(Fc, 1),
        "bn_beta": params["bn_beta"].reshape(Fc, 1),
        "w12": w12.reshape(Fc, hw, n_cls),                       # [Fc, HW, classes]
        "b12": b12.reshape(1, n_cls),
    }


@jax.jit
def custom_cnn_forward(x, prep):
    N = x.shape[0]
    Kp = prep["conv_wT"].shape[1]
    patchesT = im2col_T_3x3_pad1(x, Kp)                          # [Kp, N*H*W]
    return fused_cnn(patchesT, prep, N)                          # [N, classes]


# ------------------------- reference + init -------------------------

def reference_forward(x, params):
    # Pure-JAX reference of the same deterministic module instantiation.
    N, C, H, W = x.shape
    Fc = params["conv_w"].shape[0]
    hp = jax.lax.Precision.HIGHEST
    y = jax.lax.conv_general_dilated(
        x, params["conv_w"], window_strides=(1, 1), padding=((1, 1), (1, 1)),
        dimension_numbers=("NCHW", "OIHW", "NCHW"), precision=hp)
    y = y + params["conv_b"].reshape(1, Fc, 1, 1)
    y = jnp.maximum(y, 0.0)
    mean = jnp.mean(y, axis=(0, 2, 3), keepdims=True)
    var = jnp.mean((y - mean) ** 2, axis=(0, 2, 3), keepdims=True)
    y = (params["bn_gamma"].reshape(1, Fc, 1, 1) * (y - mean)
         * jax.lax.rsqrt(var + 1e-5) + params["bn_beta"].reshape(1, Fc, 1, 1))
    v = y.reshape(N, -1)
    h = jnp.dot(v, params["feat_w"], precision=hp) + params["feat_b"]
    logits = jnp.dot(h, params["fc_w"], precision=hp) + params["fc_b"]
    return jax.nn.softmax(logits, axis=1)


def init_params(key, nc, filters, hw, feat_dim, num_classes):
    ks = jax.random.split(key, 6)
    conv_in = nc * 3 * 3
    flat = filters * hw * hw
    return {
        "conv_w": jax.random.normal(ks[0], (filters, nc, 3, 3), jnp.float32)
                  * (1.0 / jnp.sqrt(conv_in)),
        "conv_b": jax.random.normal(ks[1], (filters,), jnp.float32) * 0.01,
        "bn_gamma": jnp.ones((filters,), jnp.float32),
        "bn_beta": jnp.zeros((filters,), jnp.float32),
        "feat_w": jax.random.normal(ks[2], (flat, feat_dim), jnp.float32)
                  * (1.0 / jnp.sqrt(flat)),
        "feat_b": jax.random.normal(ks[3], (feat_dim,), jnp.float32) * 0.01,
        "fc_w": jax.random.normal(ks[4], (feat_dim, num_classes), jnp.float32)
                * (1.0 / jnp.sqrt(feat_dim)),
        "fc_b": jax.random.normal(ks[5], (num_classes,), jnp.float32) * 0.01,
    }


if __name__ == "__main__":
    key = jax.random.PRNGKey(0)
    kx, kp = jax.random.split(key)

    N, NC, HW_SIDE = 2, 3, 16
    FILTERS, FEAT_DIM, NUM_CLASSES = 8, 32, 10

    x = jax.random.normal(kx, (N, NC, HW_SIDE, HW_SIDE), jnp.float32)
    params = init_params(kp, NC, FILTERS, HW_SIDE, FEAT_DIM, NUM_CLASSES)
    prep = prepare_params(params)

    out = jax.block_until_ready(custom_cnn_forward(x, prep))

    assert out.shape == (N, NUM_CLASSES)
    # exact-divide softmax -> rows sum to 1 tightly
    assert bool(jnp.allclose(jnp.sum(out, axis=1), 1.0, atol=1e-5))
    # match the pure-JAX reference of the same module
    ref = reference_forward(x, params)
    assert bool(jnp.allclose(out, ref, atol=1e-4))
    print("KERNEL_OK")
</pallas_src>

<mosaic_0001>
module attributes {stable_mosaic.version = 11 : i64} {
  func.func @fused_cnn_kernel(%arg0: memref<32x512xf32, #tpu.memory_space<vmem>>, %arg1: memref<8x32xf32, #tpu.memory_space<vmem>>, %arg2: memref<8x1xf32, #tpu.memory_space<vmem>>, %arg3: memref<8x1xf32, #tpu.memory_space<vmem>>, %arg4: memref<8x1xf32, #tpu.memory_space<vmem>>, %arg5: memref<8x256x10xf32, #tpu.memory_space<vmem>>, %arg6: memref<1x10xf32, #tpu.memory_space<vmem>>, %arg7: memref<2x10xf32, #tpu.memory_space<vmem>>) attributes {dimension_semantics = [], scalar_prefetch = 0 : i64, scratch_operands = 0 : i64, tpu.core_type = #tpu.core_type<tc>} {
    %c0 = arith.constant 0 : index
    %c0_0 = arith.constant 0 : index
    %0 = vector.load %arg1[%c0, %c0_0] : memref<8x32xf32, #tpu.memory_space<vmem>>, vector<8x32xf32>
    %c0_1 = arith.constant 0 : index
    %c0_2 = arith.constant 0 : index
    %1 = vector.load %arg0[%c0_1, %c0_2] : memref<32x512xf32, #tpu.memory_space<vmem>>, vector<32x512xf32>
    %cst = arith.constant dense<0.000000e+00> : vector<8x512xf32>
    %2 = tpu.matmul %0, %1, %cst {dimension_numbers = #tpu.dot_dimension_numbers<[1], [0], [0], [1], [0, 0, 1, 1], [], []>} : vector<8x32xf32>, vector<32x512xf32>, vector<8x512xf32> -> vector<8x512xf32>
    %c0_3 = arith.constant 0 : index
    %c0_4 = arith.constant 0 : index
    %3 = vector.load %arg2[%c0_3, %c0_4] : memref<8x1xf32, #tpu.memory_space<vmem>>, vector<8x1xf32>
    %4 = vector.broadcast %3 : vector<8x1xf32> to vector<8x512xf32>
    %5 = arith.addf %2, %4 : vector<8x512xf32>
    %cst_5 = arith.constant 0.000000e+00 : f32
    %6 = vector.broadcast %cst_5 : f32 to vector<8x512xf32>
    %7 = arith.maximumf %5, %6 : vector<8x512xf32>
    %cst_6 = arith.constant dense<0.000000e+00> : vector<8xf32>
    %8 = vector.multi_reduction <add>, %7, %cst_6 [1] : vector<8x512xf32> to vector<8xf32>
    %9 = vector.shape_cast %8 : vector<8xf32> to vector<8x1xf32>
    %cst_7 = arith.constant 5.120000e+02 : f32
    %10 = vector.broadcast %cst_7 : f32 to vector<8x1xf32>
    %11 = arith.divf %9, %10 : vector<8x1xf32>
    %12 = vector.broadcast %11 : vector<8x1xf32> to vector<8x512xf32>
    %13 = arith.subf %7, %12 : vector<8x512xf32>
    %14 = arith.mulf %13, %13 : vector<8x512xf32>
    %cst_8 = arith.constant dense<0.000000e+00> : vector<8xf32>
    %15 = vector.multi_reduction <add>, %14, %cst_8 [1] : vector<8x512xf32> to vector<8xf32>
    %16 = vector.shape_cast %15 : vector<8xf32> to vector<8x1xf32>
    %cst_9 = arith.constant 5.120000e+02 : f32
    %17 = vector.broadcast %cst_9 : f32 to vector<8x1xf32>
    %18 = arith.divf %16, %17 : vector<8x1xf32>
    %c0_10 = arith.constant 0 : index
    %c0_11 = arith.constant 0 : index
    %19 = vector.load %arg3[%c0_10, %c0_11] : memref<8x1xf32, #tpu.memory_space<vmem>>, vector<8x1xf32>
    %20 = vector.broadcast %19 : vector<8x1xf32> to vector<8x512xf32>
    %21 = arith.mulf %20, %13 : vector<8x512xf32>
    %cst_12 = arith.constant 9.99999974E-6 : f32
    %22 = vector.broadcast %cst_12 : f32 to vector<8x1xf32>
    %23 = arith.addf %18, %22 : vector<8x1xf32>
    %24 = math.rsqrt %23 : vector<8x1xf32>
    %25 = vector.broadcast %24 : vector<8x1xf32> to vector<8x512xf32>
    %26 = arith.mulf %21, %25 : vector<8x512xf32>
    %c0_13 = arith.constant 0 : index
    %c0_14 = arith.constant 0 : index
    %27 = vector.load %arg4[%c0_13, %c0_14] : memref<8x1xf32, #tpu.memory_space<vmem>>, vector<8x1xf32>
    %28 = vector.broadcast %27 : vector<8x1xf32> to vector<8x512xf32>
    %29 = arith.addf %26, %28 : vector<8x512xf32>
    %c0_15 = arith.constant 0 : index
    %c0_16 = arith.constant 0 : index
    %30 = vector.load %arg6[%c0_15, %c0_16] : memref<1x10xf32, #tpu.memory_space<vmem>>, vector<1x10xf32>
    %c0_17 = arith.constant 0 : index
    %c0_18 = arith.constant 0 : index
    %31 = vector.load %arg6[%c0_17, %c0_18] : memref<1x10xf32, #tpu.memory_space<vmem>>, vector<1x10xf32>
    %c0_19 = arith.constant 0 : index
    %c0_20 = arith.constant 0 : index
    %c0_21 = arith.constant 0 : index
    %32 = vector.load %arg5[%c0_19, %c0_20, %c0_21] : memref<8x256x10xf32, #tpu.memory_space<vmem>>, vector<1x256x10xf32>
    %33 = vector.shape_cast %32 : vector<1x256x10xf32> to vector<256x10xf32>
    %34 = vector.extract_strided_slice %29 {offsets = [0, 0], sizes = [1, 256], strides = [1, 1]} : vector<8x512xf32> to vector<1x256xf32>
    %cst_22 = arith.constant dense<0.000000e+00> : vector<1x10xf32>
    %35 = tpu.matmul %34, %33, %cst_22 {dimension_numbers = #tpu.dot_dimension_numbers<[1], [0], [0], [1], [0, 0, 1, 1], [], []>} : vector<1x256xf32>, vector<256x10xf32>, vector<1x10xf32> -> vector<1x10xf32>
    %36 = arith.addf %30, %35 : vector<1x10xf32>
    %37 = vector.extract_strided_slice %29 {offsets = [0, 256], sizes = [1, 256], strides = [1, 1]} : vector<8x512xf32> to vector<1x256xf32>
    %cst_23 = arith.constant dense<0.000000e+00> : vector<1x10xf32>
    %38 = tpu.matmul %37, %33, %cst_23 {dimension_numbers = #tpu.dot_dimension_numbers<[1], [0], [0], [1], [0, 0, 1, 1], [], []>} : vector<1x256xf32>, vector<256x10xf32>, vector<1x10xf32> -> vector<1x10xf32>
    %39 = arith.addf %31, %38 : vector<1x10xf32>
    %c1 = arith.constant 1 : index
    %c0_24 = arith.constant 0 : index
    %c0_25 = arith.constant 0 : index
    %40 = vector.load %arg5[%c1, %c0_24, %c0_25] : memref<8x256x10xf32, #tpu.memory_space<vmem>>, vector<1x256x10xf32>
    %41 = vector.shape_cast %40 : vector<1x256x10xf32> to vector<256x10xf32>
    %42 = vector.extract_strided_slice %29 {offsets = [1, 0], sizes = [1, 256], strides = [1, 1]} : vector<8x512xf32> to vector<1x256xf32>
    %cst_26 = arith.constant dense<0.000000e+00> : vector<1x10xf32>
    %43 = tpu.matmul %42, %41, %cst_26 {dimension_numbers = #tpu.dot_dimension_numbers<[1], [0], [0], [1], [0, 0, 1, 1], [], []>} : vector<1x256xf32>, vector<256x10xf32>, vector<1x10xf32> -> vector<1x10xf32>
    %44 = arith.addf %36, %43 : vector<1x10xf32>
    %45 = vector.extract_strided_slice %29 {offsets = [1, 256], sizes = [1, 256], strides = [1, 1]} : vector<8x512xf32> to vector<1x256xf32>
    %cst_27 = arith.constant dense<0.000000e+00> : vector<1x10xf32>
    %46 = tpu.matmul %45, %41, %cst_27 {dimension_numbers = #tpu.dot_dimension_numbers<[1], [0], [0], [1], [0, 0, 1, 1], [], []>} : vector<1x256xf32>, vector<256x10xf32>, vector<1x10xf32> -> vector<1x10xf32>
    %47 = arith.addf %39, %46 : vector<1x10xf32>
    %c2 = arith.constant 2 : index
    %c0_28 = arith.constant 0 : index
    %c0_29 = arith.constant 0 : index
    %48 = vector.load %arg5[%c2, %c0_28, %c0_29] : memref<8x256x10xf32, #tpu.memory_space<vmem>>, vector<1x256x10xf32>
    %49 = vector.shape_cast %48 : vector<1x256x10xf32> to vector<256x10xf32>
    %50 = vector.extract_strided_slice %29 {offsets = [2, 0], sizes = [1, 256], strides = [1, 1]} : vector<8x512xf32> to vector<1x256xf32>
    %cst_30 = arith.constant dense<0.000000e+00> : vector<1x10xf32>
    %51 = tpu.matmul %50, %49, %cst_30 {dimension_numbers = #tpu.dot_dimension_numbers<[1], [0], [0], [1], [0, 0, 1, 1], [], []>} : vector<1x256xf32>, vector<256x10xf32>, vector<1x10xf32> -> vector<1x10xf32>
    %52 = arith.addf %44, %51 : vector<1x10xf32>
    %53 = vector.extract_strided_slice %29 {offsets = [2, 256], sizes = [1, 256], strides = [1, 1]} : vector<8x512xf32> to vector<1x256xf32>
    %cst_31 = arith.constant dense<0.000000e+00> : vector<1x10xf32>
    %54 = tpu.matmul %53, %49, %cst_31 {dimension_numbers = #tpu.dot_dimension_numbers<[1], [0], [0], [1], [0, 0, 1, 1], [], []>} : vector<1x256xf32>, vector<256x10xf32>, vector<1x10xf32> -> vector<1x10xf32>
    %55 = arith.addf %47, %54 : vector<1x10xf32>
    %c3 = arith.constant 3 : index
    %c0_32 = arith.constant 0 : index
    %c0_33 = arith.constant 0 : index
    %56 = vector.load %arg5[%c3, %c0_32, %c0_33] : memref<8x256x10xf32, #tpu.memory_space<vmem>>, vector<1x256x10xf32>
    %57 = vector.shape_cast %56 : vector<1x256x10xf32> to vector<256x10xf32>
    %58 = vector.extract_strided_slice %29 {offsets = [3, 0], sizes = [1, 256], strides = [1, 1]} : vector<8x512xf32> to vector<1x256xf32>
    %cst_34 = arith.constant dense<0.000000e+00> : vector<1x10xf32>
    %59 = tpu.matmul %58, %57, %cst_34 {dimension_numbers = #tpu.dot_dimension_numbers<[1], [0], [0], [1], [0, 0, 1, 1], [], []>} : vector<1x256xf32>, vector<256x10xf32>, vector<1x10xf32> -> vector<1x10xf32>
    %60 = arith.addf %52, %59 : vector<1x10xf32>
    %61 = vector.extract_strided_slice %29 {offsets = [3, 256], sizes = [1, 256], strides = [1, 1]} : vector<8x512xf32> to vector<1x256xf32>
    %cst_35 = arith.constant dense<0.000000e+00> : vector<1x10xf32>
    %62 = tpu.matmul %61, %57, %cst_35 {dimension_numbers = #tpu.dot_dimension_numbers<[1], [0], [0], [1], [0, 0, 1, 1], [], []>} : vector<1x256xf32>, vector<256x10xf32>, vector<1x10xf32> -> vector<1x10xf32>
    %63 = arith.addf %55, %62 : vector<1x10xf32>
    %c4 = arith.constant 4 : index
    %c0_36 = arith.constant 0 : index
    %c0_37 = arith.constant 0 : index
    %64 = vector.load %arg5[%c4, %c0_36, %c0_37] : memref<8x256x10xf32, #tpu.memory_space<vmem>>, vector<1x256x10xf32>
    %65 = vector.shape_cast %64 : vector<1x256x10xf32> to vector<256x10xf32>
    %66 = vector.extract_strided_slice %29 {offsets = [4, 0], sizes = [1, 256], strides = [1, 1]} : vector<8x512xf32> to vector<1x256xf32>
    %cst_38 = arith.constant dense<0.000000e+00> : vector<1x10xf32>
    %67 = tpu.matmul %66, %65, %cst_38 {dimension_numbers = #tpu.dot_dimension_numbers<[1], [0], [0], [1], [0, 0, 1, 1], [], []>} : vector<1x256xf32>, vector<256x10xf32>, vector<1x10xf32> -> vector<1x10xf32>
    %68 = arith.addf %60, %67 : vector<1x10xf32>
    %69 = vector.extract_strided_slice %29 {offsets = [4, 256], sizes = [1, 256], strides = [1, 1]} : vector<8x512xf32> to vector<1x256xf32>
    %cst_39 = arith.constant dense<0.000000e+00> : vector<1x10xf32>
    %70 = tpu.matmul %69, %65, %cst_39 {dimension_numbers = #tpu.dot_dimension_numbers<[1], [0], [0], [1], [0, 0, 1, 1], [], []>} : vector<1x256xf32>, vector<256x10xf32>, vector<1x10xf32> -> vector<1x10xf32>
    %71 = arith.addf %63, %70 : vector<1x10xf32>
    %c5 = arith.constant 5 : index
    %c0_40 = arith.constant 0 : index
    %c0_41 = arith.constant 0 : index
    %72 = vector.load %arg5[%c5, %c0_40, %c0_41] : memref<8x256x10xf32, #tpu.memory_space<vmem>>, vector<1x256x10xf32>
    %73 = vector.shape_cast %72 : vector<1x256x10xf32> to vector<256x10xf32>
    %74 = vector.extract_strided_slice %29 {offsets = [5, 0], sizes = [1, 256], strides = [1, 1]} : vector<8x512xf32> to vector<1x256xf32>
    %cst_42 = arith.constant dense<0.000000e+00> : vector<1x10xf32>
    %75 = tpu.matmul %74, %73, %cst_42 {dimension_numbers = #tpu.dot_dimension_numbers<[1], [0], [0], [1], [0, 0, 1, 1], [], []>} : vector<1x256xf32>, vector<256x10xf32>, vector<1x10xf32> -> vector<1x10xf32>
    %76 = arith.addf %68, %75 : vector<1x10xf32>
    %77 = vector.extract_strided_slice %29 {offsets = [5, 256], sizes = [1, 256], strides = [1, 1]} : vector<8x512xf32> to vector<1x256xf32>
    %cst_43 = arith.constant dense<0.000000e+00> : vector<1x10xf32>
    %78 = tpu.matmul %77, %73, %cst_43 {dimension_numbers = #tpu.dot_dimension_numbers<[1], [0], [0], [1], [0, 0, 1, 1], [], []>} : vector<1x256xf32>, vector<256x10xf32>, vector<1x10xf32> -> vector<1x10xf32>
    %79 = arith.addf %71, %78 : vector<1x10xf32>
    %c6 = arith.constant 6 : index
    %c0_44 = arith.constant 0 : index
    %c0_45 = arith.constant 0 : index
    %80 = vector.load %arg5[%c6, %c0_44, %c0_45] : memref<8x256x10xf32, #tpu.memory_space<vmem>>, vector<1x256x10xf32>
    %81 = vector.shape_cast %80 : vector<1x256x10xf32> to vector<256x10xf32>
    %82 = vector.extract_strided_slice %29 {offsets = [6, 0], sizes = [1, 256], strides = [1, 1]} : vector<8x512xf32> to vector<1x256xf32>
    %cst_46 = arith.constant dense<0.000000e+00> : vector<1x10xf32>
    %83 = tpu.matmul %82, %81, %cst_46 {dimension_numbers = #tpu.dot_dimension_numbers<[1], [0], [0], [1], [0, 0, 1, 1], [], []>} : vector<1x256xf32>, vector<256x10xf32>, vector<1x10xf32> -> vector<1x10xf32>
    %84 = arith.addf %76, %83 : vector<1x10xf32>
    %85 = vector.extract_strided_slice %29 {offsets = [6, 256], sizes = [1, 256], strides = [1, 1]} : vector<8x512xf32> to vector<1x256xf32>
    %cst_47 = arith.constant dense<0.000000e+00> : vector<1x10xf32>
    %86 = tpu.matmul %85, %81, %cst_47 {dimension_numbers = #tpu.dot_dimension_numbers<[1], [0], [0], [1], [0, 0, 1, 1], [], []>} : vector<1x256xf32>, vector<256x10xf32>, vector<1x10xf32> -> vector<1x10xf32>
    %87 = arith.addf %79, %86 : vector<1x10xf32>
    %c7 = arith.constant 7 : index
    %c0_48 = arith.constant 0 : index
    %c0_49 = arith.constant 0 : index
    %88 = vector.load %arg5[%c7, %c0_48, %c0_49] : memref<8x256x10xf32, #tpu.memory_space<vmem>>, vector<1x256x10xf32>
    %89 = vector.shape_cast %88 : vector<1x256x10xf32> to vector<256x10xf32>
    %90 = vector.extract_strided_slice %29 {offsets = [7, 0], sizes = [1, 256], strides = [1, 1]} : vector<8x512xf32> to vector<1x256xf32>
    %cst_50 = arith.constant dense<0.000000e+00> : vector<1x10xf32>
    %91 = tpu.matmul %90, %89, %cst_50 {dimension_numbers = #tpu.dot_dimension_numbers<[1], [0], [0], [1], [0, 0, 1, 1], [], []>} : vector<1x256xf32>, vector<256x10xf32>, vector<1x10xf32> -> vector<1x10xf32>
    %92 = arith.addf %84, %91 : vector<1x10xf32>
    %93 = vector.extract_strided_slice %29 {offsets = [7, 256], sizes = [1, 256], strides = [1, 1]} : vector<8x512xf32> to vector<1x256xf32>
    %cst_51 = arith.constant dense<0.000000e+00> : vector<1x10xf32>
    %94 = tpu.matmul %93, %89, %cst_51 {dimension_numbers = #tpu.dot_dimension_numbers<[1], [0], [0], [1], [0, 0, 1, 1], [], []>} : vector<1x256xf32>, vector<256x10xf32>, vector<1x10xf32> -> vector<1x10xf32>
    %95 = arith.addf %87, %94 : vector<1x10xf32>
    %cst_52 = arith.constant dense<0xFF800000> : vector<1xf32>
    %96 = vector.multi_reduction <maximumf>, %92, %cst_52 [1] : vector<1x10xf32> to vector<1xf32>
    %97 = vector.shape_cast %96 : vector<1xf32> to vector<1x1xf32>
    %98 = vector.broadcast %97 : vector<1x1xf32> to vector<1x10xf32>
    %99 = arith.subf %92, %98 : vector<1x10xf32>
    %100 = math.exp %99 : vector<1x10xf32>
    %cst_53 = arith.constant dense<0.000000e+00> : vector<1xf32>
    %101 = vector.multi_reduction <add>, %100, %cst_53 [1] : vector<1x10xf32> to vector<1xf32>
    %102 = vector.shape_cast %101 : vector<1xf32> to vector<1x1xf32>
    %103 = vector.broadcast %102 : vector<1x1xf32> to vector<1x10xf32>
    %104 = arith.divf %100, %103 : vector<1x10xf32>
    %c0_54 = arith.constant 0 : index
    %c0_55 = arith.constant 0 : index
    %105 = vector.load %arg7[%c0_54, %c0_55] : memref<2x10xf32, #tpu.memory_space<vmem>>, vector<1x10xf32>
    tpu.vector_store %arg7[%c0_54, %c0_55], %104 {strides = array<i32>} : memref<2x10xf32, #tpu.memory_space<vmem>>, vector<1x10xf32>,
    %cst_56 = arith.constant dense<0xFF800000> : vector<1xf32>
    %106 = vector.multi_reduction <maximumf>, %95, %cst_56 [1] : vector<1x10xf32> to vector<1xf32>
    %107 = vector.shape_cast %106 : vector<1xf32> to vector<1x1xf32>
    %108 = vector.broadcast %107 : vector<1x1xf32> to vector<1x10xf32>
    %109 = arith.subf %95, %108 : vector<1x10xf32>
    %110 = math.exp %109 : vector<1x10xf32>
    %cst_57 = arith.constant dense<0.000000e+00> : vector<1xf32>
    %111 = vector.multi_reduction <add>, %110, %cst_57 [1] : vector<1x10xf32> to vector<1xf32>
    %112 = vector.shape_cast %111 : vector<1xf32> to vector<1x1xf32>
    %113 = vector.broadcast %112 : vector<1x1xf32> to vector<1x10xf32>
    %114 = arith.divf %110, %113 : vector<1x10xf32>
    %c1_58 = arith.constant 1 : index
    %c0_59 = arith.constant 0 : index
    %115 = vector.load %arg7[%c1_58, %c0_59] : memref<2x10xf32, #tpu.memory_space<vmem>>, vector<1x10xf32>
    tpu.vector_store %arg7[%c1_58, %c0_59], %114 {strides = array<i32>} : memref<2x10xf32, #tpu.memory_space<vmem>>, vector<1x10xf32>,
    return
  }
}

</mosaic_0001>

<bundles_post_ra>
// kernel: custom_cnn_forward.1
= control target key start
LH: loop header
LB: loop body
LE: loop exit
PB: predicated region body
PF: predicated region fallthrough
CT: control target
= control target key end

     0   :  { %s3512_s0 = inlined_call_operand.vmem [shape: f32[32,512], index: 0, kind: input, shape index: {}]   ;;  %s3513_s1 = inlined_call_operand.vmem [shape: f32[8,32], index: 1, kind: input, shape index: {}]   ;;  %s3514_s2 = inlined_call_operand.vmem [shape: f32[8,1], index: 2, kind: input, shape index: {}]   ;;  %s3515_s3 = inlined_call_operand.vmem [shape: f32[8,1], index: 3, kind: input, shape index: {}]   ;;  %s3516_s4 = inlined_call_operand.vmem [shape: f32[8,1], index: 4, kind: input, shape index: {}]   ;;  %s3517_s5 = inlined_call_operand.vmem [shape: f32[8,256,10], index: 5, kind: input, shape index: {}]   ;;  %s3518_s6 = inlined_call_operand.vmem [shape: f32[1,10], index: 6, kind: input, shape index: {}]   ;;  %s3519_s7 = inlined_call_operand.hbm [shape: f32[2,10], index: 7, kind: output, shape index: {}]  }
   0x1   :  { %v41_v0 = vld [vmem:[%s3512_s0 + $0x68] sm:$0xff]  ;;  %v43_v1 = vld [vmem:[%s3512_s0 + $0x78] sm:$0xff]  ;;  %v40_v2 = vld [vmem:[%s3512_s0 + $0x60] sm:$0xff] }
   0x2   :  { %78 = vmatprep.subr.mxu0 %v41_v0  ;;  %149 = vmatprep.subr.mxu1 %v43_v1  ;;  %v42_v3 = vld [vmem:[%s3512_s0 + $0x70] sm:$0xff]  ;;  %v37_v4 = vld [vmem:[%s3512_s0 + $0x48] sm:$0xff]  ;;  %v39_v5 = vld [vmem:[%s3512_s0 + $0x58] sm:$0xff] }
   0x3   :  { %79 = vmatpush1.msra.mxu0 %v40_v2  ;;  %150 = vmatpush1.msra.mxu1 %v42_v3  ;;  %v36_v6 = vld [vmem:[%s3512_s0 + $0x40] sm:$0xff]  ;;  %v38_v7 = vld [vmem:[%s3512_s0 + $0x50] sm:$0xff]  ;;  %v33_v8 = vld [vmem:[%s3512_s0 + $0x28] sm:$0xff] }
   0x4   :  { %80 = vmatprep.subr.mxu0 %v37_v4  ;;  %151 = vmatprep.subr.mxu1 %v39_v5  ;;  %v35_v9 = vld [vmem:[%s3512_s0 + $0x38] sm:$0xff]  ;;  %v32_v10 = vld [vmem:[%s3512_s0 + $0x20] sm:$0xff]  ;;  %v34_v11 = vld [vmem:[%s3512_s0 + $0x30] sm:$0xff] }
   0x5   :  { %81 = vmatpush1.msra.mxu0 %v36_v6  ;;  %152 = vmatpush1.msra.mxu1 %v38_v7  ;;  %v29_v12 = vld [vmem:[%s3512_s0 + $0x8] sm:$0xff]  ;;  %v31_v13 = vld [vmem:[%s3512_s0 + $0x18] sm:$0xff]  ;;  %v28_v14 = vld [vmem:[%s3512_s0] sm:$0xff] }
   0x6   :  { %82 = vmatprep.subr.mxu0 %v33_v8  ;;  %153 = vmatprep.subr.mxu1 %v35_v9  ;;  %v30_v15 = vld [vmem:[%s3512_s0 + $0x10] sm:$0xff] }
   0x7   :  { %83 = vmatpush1.msra.mxu0 %v32_v10  ;;  %154 = vmatpush1.msra.mxu1 %v34_v11 }
   0x8   :  { %12 = vsyncpa [#allocation3], 0  ;;  %84 = vmatprep.subr.mxu0 %v29_v12  ;;  %155 = vmatprep.subr.mxu1 %v31_v13  ;;  %v27_v16 = vld [vmem:[%s3513_s1] sm:$0xff]  ;;  %vm50_vm0 = vcmask 261120   ;;  %v2569_v17 = vmov 0.0   ;;  %v2570_v19 = vmov 0  }
   0x9   :  { %85 = vmatpush1.msra.mxu0 %v28_v14  ;;  %118 = vmatprep.mubr.f32.mxu0 %v2569_v17  ;;  %v44_v18 = vld [vmem:[%s3514_s2] sm:$0xff]  ;;  %v279_v37 = vld [vmem:[%s3517_s5 + $0xf8] sm:$0xff]  ;;  %v278_v39 = vld [vmem:[%s3517_s5 + $0xf0] sm:$0xff]  ;;  %vm1707_vm1 = vcmask 73728  }
   0xa   :  { %156 = vmatpush1.msra.mxu1 %v30_v15  ;;  %189 = vmatprep.mubr.f32.mxu1 %v2569_v17  ;;  %v221_v20 = vld [vmem:[%s3515_s3] sm:$0xff]  ;;  %v263_v38 = vld [vmem:[%s3517_s5 + $0x78] sm:$0xff]  ;;  %v262_v40 = vld [vmem:[%s3517_s5 + $0x70] sm:$0xff] }
   0xb   :  { %1746 = vmatmul.mubr.msk.f32.vlgmr.msra.gmra.mxu0 %vm50_vm0, %v27_v16  ;;  %1747 = vmatmul.mubr.msk.f32.vlgmr.msra.gmra.mxu1 %vm50_vm0, %v27_v16  ;;  %v277_v41 = vld [vmem:[%s3517_s5 + $0xe8] sm:$0xff]  ;;  %v276_v43 = vld [vmem:[%s3517_s5 + $0xe0] sm:$0xff]  ;;  %v275_v45 = vld [vmem:[%s3517_s5 + $0xd8] sm:$0xff] }
   0xc   :  { %2535 = vset.pattern.permute.xlu0 %v2570_v19  ;;  %2536 = vset.pattern.permute.xlu1 %v2570_v19  ;;  %v261_v42 = vld [vmem:[%s3517_s5 + $0x68] sm:$0xff]  ;;  %v260_v44 = vld [vmem:[%s3517_s5 + $0x60] sm:$0xff]  ;;  %v259_v46 = vld [vmem:[%s3517_s5 + $0x58] sm:$0xff] }
   0xd   :  { %47 = vperm.xlu0 %2535, %v44_v18   ;;  %224 = vperm.xlu1 %2536, %v221_v20   ;;  %v274_v60 = vld [vmem:[%s3517_s5 + $0xd0] sm:$0xff]  ;;  %v273_v62 = vld [vmem:[%s3517_s5 + $0xc8] sm:$0xff]  ;;  %v272_v0 = vld [vmem:[%s3517_s5 + $0xc0] sm:$0xff] }
   0xe   :  { %1972 = vmatprep.subr.mxu0 %v279_v37  ;;  %2007 = vmatprep.subr.mxu1 %v279_v37  ;;  %v258_v61 = vld [vmem:[%s3517_s5 + $0x50] sm:$0xff]  ;;  %v257_v63 = vld [vmem:[%s3517_s5 + $0x48] sm:$0xff]  ;;  %v237_v1 = vld [vmem:[%s3516_s4] sm:$0xff] }
   0xf   :  { %1973 = vmatpush3.msra.mxu0 %v263_v38  ;;  %2008 = vmatpush3.msra.mxu1 %v263_v38  ;;  %v256_v2 = vld [vmem:[%s3517_s5 + $0x40] sm:$0xff]  ;;  %v271_v3 = vld [vmem:[%s3517_s5 + $0xb8] sm:$0xff]  ;;  %v270_v5 = vld [vmem:[%s3517_s5 + $0xb0] sm:$0xff] }
  0x10   :  { %1974 = vmatprep.subr.mxu0 %v278_v39  ;;  %2009 = vmatprep.subr.mxu1 %v278_v39  ;;  %v255_v4 = vld [vmem:[%s3517_s5 + $0x38] sm:$0xff]  ;;  %v254_v6 = vld [vmem:[%s3517_s5 + $0x30] sm:$0xff]  ;;  %v269_v7 = vld [vmem:[%s3517_s5 + $0xa8] sm:$0xff] }
  0x11   :  { %1975 = vmatpush3.msra.mxu0 %v262_v40  ;;  %2010 = vmatpush3.msra.mxu1 %v262_v40  ;;  %v253_v8 = vld [vmem:[%s3517_s5 + $0x28] sm:$0xff]  ;;  %v268_v9 = vld [vmem:[%s3517_s5 + $0xa0] sm:$0xff]  ;;  %v267_v11 = vld [vmem:[%s3517_s5 + $0x98] sm:$0xff] }
  0x12   :  { %1976 = vmatprep.subr.mxu0 %v277_v41  ;;  %2011 = vmatprep.subr.mxu1 %v277_v41  ;;  %v252_v10 = vld [vmem:[%s3517_s5 + $0x20] sm:$0xff]  ;;  %v251_v12 = vld [vmem:[%s3517_s5 + $0x18] sm:$0xff]  ;;  %v266_v13 = vld [vmem:[%s3517_s5 + $0x90] sm:$0xff] }
  0x13   :  { %1977 = vmatpush3.msra.mxu0 %v261_v42  ;;  %2012 = vmatpush3.msra.mxu1 %v261_v42  ;;  %v250_v14 = vld [vmem:[%s3517_s5 + $0x10] sm:$0xff]  ;;  %v265_v15 = vld [vmem:[%s3517_s5 + $0x88] sm:$0xff]  ;;  %v264_v17 = vld [vmem:[%s3517_s5 + $0x80] sm:$0xff] }
  0x14   :  { %1978 = vmatprep.subr.mxu0 %v276_v43  ;;  %2013 = vmatprep.subr.mxu1 %v276_v43  ;;  %v249_v16 = vld [vmem:[%s3517_s5 + $0x8] sm:$0xff]  ;;  %v248_v18 = vld [vmem:[%s3517_s5] sm:$0xff]  ;;  %v1779_v19 = vld [vmem:[%s3517_s5 + $0x1f8] sm:$0xff] }
  0x15   :  { %1979 = vmatpush3.msra.mxu0 %v260_v44  ;;  %2014 = vmatpush3.msra.mxu1 %v260_v44  ;;  %v1763_v38 = vld [vmem:[%s3517_s5 + $0x178] sm:$0xff]  ;;  %v1778_v39 = vld [vmem:[%s3517_s5 + $0x1f0] sm:$0xff]  ;;  %v1777_v43 = vld [vmem:[%s3517_s5 + $0x1e8] sm:$0xff] }
  0x16   :  { %1980 = vmatprep.subr.mxu0 %v275_v45  ;;  %2015 = vmatprep.subr.mxu1 %v275_v45  ;;  %v1762_v42 = vld [vmem:[%s3517_s5 + $0x170] sm:$0xff]  ;;  %v1761_v44 = vld [vmem:[%s3517_s5 + $0x168] sm:$0xff]  ;;  %v1776_v45 = vld [vmem:[%s3517_s5 + $0x1e0] sm:$0xff] }
  0x17   :  { %1981 = vmatpush3.msra.mxu0 %v259_v46  ;;  %2016 = vmatpush3.msra.mxu1 %v259_v46  ;;  %v1760_v46 = vld [vmem:[%s3517_s5 + $0x160] sm:$0xff] }
  0x18   :  { %1982 = vmatprep.subr.mxu0 %v274_v60  ;;  %2017 = vmatprep.subr.mxu1 %v274_v60  ;;  %v1753_v60 = vld [vmem:[%s3517_s5 + $0x128] sm:$0xff] }
  0x19   :  { %1983 = vmatpush3.msra.mxu0 %v258_v61  ;;  %2018 = vmatpush3.msra.mxu1 %v258_v61  ;;  %v1768_v61 = vld [vmem:[%s3517_s5 + $0x1a0] sm:$0xff] }
  0x1a   :  { %1984 = vmatprep.subr.mxu0 %v273_v62  ;;  %2019 = vmatprep.subr.mxu1 %v273_v62  ;;  %v1752_v62 = vld [vmem:[%s3517_s5 + $0x120] sm:$0xff] }
  0x1b   :  { %1985 = vmatpush3.msra.mxu0 %v257_v63  ;;  %2020 = vmatpush3.msra.mxu1 %v257_v63  ;;  %v1767_v63 = vld [vmem:[%s3517_s5 + $0x198] sm:$0xff] }
  0x1c   :  { %1986 = vmatprep.subr.mxu0 %v272_v0  ;;  %2021 = vmatprep.subr.mxu1 %v272_v0  ;;  %v1751_v0 = vld [vmem:[%s3517_s5 + $0x118] sm:$0xff] }
  0x1d   :  { %1987 = vmatpush3.msra.mxu0 %v256_v2  ;;  %2022 = vmatpush3.msra.mxu1 %v256_v2  ;;  %v1750_v2 = vld [vmem:[%s3517_s5 + $0x110] sm:$0xff] }
  0x1e   :  { %1988 = vmatprep.subr.mxu0 %v271_v3  ;;  %2023 = vmatprep.subr.mxu1 %v271_v3  ;;  %v1765_v3 = vld [vmem:[%s3517_s5 + $0x188] sm:$0xff] }
  0x1f   :  { %1989 = vmatpush3.msra.mxu0 %v255_v4  ;;  %2024 = vmatpush3.msra.mxu1 %v255_v4  ;;  %v1749_v4 = vld [vmem:[%s3517_s5 + $0x108] sm:$0xff] }
  0x20   :  { %1990 = vmatprep.subr.mxu0 %v270_v5  ;;  %2025 = vmatprep.subr.mxu1 %v270_v5  ;;  %v1764_v5 = vld [vmem:[%s3517_s5 + $0x180] sm:$0xff] }
  0x21   :  { %1991 = vmatpush3.msra.mxu0 %v254_v6  ;;  %2026 = vmatpush3.msra.mxu1 %v254_v6  ;;  %v1748_v6 = vld [vmem:[%s3517_s5 + $0x100] sm:$0xff] }
  0x22   :  { %1992 = vmatprep.subr.mxu0 %v269_v7  ;;  %2027 = vmatprep.subr.mxu1 %v269_v7 }
  0x23   :  { %1993 = vmatpush3.msra.mxu0 %v253_v8  ;;  %2028 = vmatpush3.msra.mxu1 %v253_v8 }
  0x24   :  { %1994 = vmatprep.subr.mxu0 %v268_v9  ;;  %2029 = vmatprep.subr.mxu1 %v268_v9  ;;  %v1811_v9 = vld [vmem:[%s3517_s5 + $0x2f8] sm:$0xff] }
  0x25   :  { %1995 = vmatpush3.msra.mxu0 %v252_v10  ;;  %2030 = vmatpush3.msra.mxu1 %v252_v10  ;;  %v1795_v10 = vld [vmem:[%s3517_s5 + $0x278] sm:$0xff] }
  0x26   :  { %1996 = vmatprep.subr.mxu0 %v267_v11  ;;  %2031 = vmatprep.subr.mxu1 %v267_v11 }
  0x27   :  { %1997 = vmatpush3.msra.mxu0 %v251_v12  ;;  %2032 = vmatpush3.msra.mxu1 %v251_v12 }
  0x28   :  { %1998 = vmatprep.subr.mxu0 %v266_v13  ;;  %2033 = vmatprep.subr.mxu1 %v266_v13  ;;  %v1810_v13 = vld [vmem:[%s3517_s5 + $0x2f0] sm:$0xff] }
  0x29   :  { %1999 = vmatpush3.msra.mxu0 %v250_v14  ;;  %2034 = vmatpush3.msra.mxu1 %v250_v14  ;;  %v1794_v14 = vld [vmem:[%s3517_s5 + $0x270] sm:$0xff] }
  0x2a   :  { %2000 = vmatprep.subr.mxu0 %v265_v15  ;;  %2035 = vmatprep.subr.mxu1 %v265_v15  ;;  %v1809_v15 = vld [vmem:[%s3517_s5 + $0x2e8] sm:$0xff] }
  0x2b   :  { %2001 = vmatpush3.msra.mxu0 %v249_v16  ;;  %2036 = vmatpush3.msra.mxu1 %v249_v16  ;;  %v1793_v16 = vld [vmem:[%s3517_s5 + $0x268] sm:$0xff] }
  0x2c   :  { %2002 = vmatprep.subr.mxu0 %v264_v17  ;;  %2037 = vmatprep.subr.mxu1 %v264_v17  ;;  %v1808_v17 = vld [vmem:[%s3517_s5 + $0x2e0] sm:$0xff] }
  0x2d   :  { %2003 = vmatpush3.msra.mxu0 %v248_v18  ;;  %2038 = vmatpush3.msra.mxu1 %v248_v18  ;;  %v1792_v18 = vld [vmem:[%s3517_s5 + $0x260] sm:$0xff] }
  0x2e   :  { %2042 = vmatprep.subr.mxu0 %v1779_v19  ;;  %2077 = vmatprep.subr.mxu1 %v1779_v19  ;;  %v1807_v19 = vld [vmem:[%s3517_s5 + $0x2d8] sm:$0xff] }
  0x88   :  { %v48_v21 = vpop.permute.xlu0 %47  ;;  %v225_v20 = vpop.permute.xlu1 %224 }
  0xcb   :  { %v120_v22 = vpop.f32.mrf.mxu0  ;;  %v191_v23 = vpop.f32.mrf.mxu1 }
  0xcc   :  { %v121_v24 = vadd.f32 %v120_v22, %v48_v21  ;;  %v192_v27 = vadd.f32 %v191_v23, %v48_v21 }
  0xcd   :  { %v122_v25 = vpop.f32.mrf.mxu0  ;;  %v193_v26 = vpop.f32.mrf.mxu1 }
  0xce   :  { %v123_v28 = vadd.f32 %v122_v25, %v48_v21  ;;  %v196_v29 = vmax.f32 %v121_v24, 0.0  ;;  %v194_v31 = vadd.f32 %v193_v26, %v48_v21  ;;  %v198_v32 = vmax.f32 %v192_v27, 0.0 }
  0xd0   :  { %v197_v30 = vmax.f32 %v123_v28, 0.0  ;;  %v199_v34 = vmax.f32 %v194_v31, 0.0 }
  0xd2   :  { %v200_v33 = vadd.f32 %v197_v30, %v196_v29 }
  0xd4   :  { %v201_v35 = vadd.f32 %v200_v33, %v198_v32 }
  0xd6   :  { %v202_v36 = vadd.f32 %v201_v35, %v199_v34 }
  0xd8   :  { %203 = vadd.xlane.f32.xlu0 %v202_v36 }
 0x161   :  { %v204_v47 = vpop.xlane.xlu0 %203 }
 0x162   :  { %v206_v48 = vmul.f32 0.001953125, %v204_v47  ;;  %v1775_v47 = vld [vmem:[%s3517_s5 + $0x1d8] sm:$0xff] }
 0x164   :  { %v2699_v49 = vsub.f32 %v196_v29, %v206_v48  ;;  %v2701_v50 = vsub.f32 %v197_v30, %v206_v48  ;;  %v2703_v51 = vsub.f32 %v198_v32, %v206_v48  ;;  %v2707_v53 = vsub.f32 %v199_v34, %v206_v48  ;;  %v1759_v48 = vld [vmem:[%s3517_s5 + $0x158] sm:$0xff] }
 0x166   :  { %v211_v52 = vmul.f32 %v2699_v49, %v2699_v49  ;;  %v212_v54 = vmul.f32 %v2701_v50, %v2701_v50  ;;  %v213_v55 = vmul.f32 %v2703_v51, %v2703_v51  ;;  %v214_v57 = vmul.f32 %v2707_v53, %v2707_v53 }
 0x167   :  { %v227_v24 = vmul.f32 %v225_v20, %v2699_v49  ;;  %v228_v25 = vmul.f32 %v225_v20, %v2701_v50  ;;  %v229_v26 = vmul.f32 %v225_v20, %v2703_v51  ;;  %v230_v27 = vmul.f32 %v225_v20, %v2707_v53  ;;  %v1774_v49 = vld [vmem:[%s3517_s5 + $0x1d0] sm:$0xff]  ;;  %v1773_v51 = vld [vmem:[%s3517_s5 + $0x1c8] sm:$0xff]  ;;  %v1772_v53 = vld [vmem:[%s3517_s5 + $0x1c0] sm:$0xff] }
 0x168   :  { %v215_v56 = vadd.f32 %v212_v54, %v211_v52  ;;  %v1758_v50 = vld [vmem:[%s3517_s5 + $0x150] sm:$0xff]  ;;  %v1757_v52 = vld [vmem:[%s3517_s5 + $0x148] sm:$0xff]  ;;  %v1756_v54 = vld [vmem:[%s3517_s5 + $0x140] sm:$0xff] }
 0x169   :  { %v1791_v20 = vld [vmem:[%s3517_s5 + $0x258] sm:$0xff] }
 0x16a   :  { %v216_v58 = vadd.f32 %v215_v56, %v213_v55  ;;  %v1771_v55 = vld [vmem:[%s3517_s5 + $0x1b8] sm:$0xff] }
 0x16b   :  { %v1755_v56 = vld [vmem:[%s3517_s5 + $0x138] sm:$0xff] }
 0x16c   :  { %v217_v59 = vadd.f32 %v216_v58, %v214_v57  ;;  %v1770_v57 = vld [vmem:[%s3517_s5 + $0x1b0] sm:$0xff] }
 0x16d   :  { %v1754_v58 = vld [vmem:[%s3517_s5 + $0x130] sm:$0xff] }
 0x16e   :  { %218 = vadd.xlane.f32.xlu1 %v217_v59  ;;  %v1769_v59 = vld [vmem:[%s3517_s5 + $0x1a8] sm:$0xff] }
 0x17f   :  { %240 = vperm.xlu1 %2536, %v237_v1   ;;  %v1766_v1 = vld [vmem:[%s3517_s5 + $0x190] sm:$0xff] }
 0x1f7   :  { %v219_v21 = vpop.xlane.xlu1 %218 }
 0x1f8   :  { %v220_v22 = vmul.f32 0.001953125, %v219_v21  ;;  %v1806_v21 = vld [vmem:[%s3517_s5 + $0x2d0] sm:$0xff] }
 0x1fa   :  { %v231_v23 = vadd.f32 1e-05, %v220_v22  ;;  %v1790_v22 = vld [vmem:[%s3517_s5 + $0x250] sm:$0xff] }
 0x1fb   :  { %v241_v33 = vpop.permute.xlu1 %240 }
 0x1fc   :  { %2537 = vrsqrt.f32 %v231_v23  ;;  %v1805_v23 = vld [vmem:[%s3517_s5 + $0x2c8] sm:$0xff] }
 0x209   :  { %v2538_v28 = vpop.eup %2537 }
 0x20a   :  { %v233_v29 = vmul.f32 %v2538_v28, %v227_v24  ;;  %v234_v30 = vmul.f32 %v2538_v28, %v228_v25  ;;  %v235_v31 = vmul.f32 %v2538_v28, %v229_v26  ;;  %v236_v32 = vmul.f32 %v2538_v28, %v230_v27  ;;  %v1789_v24 = vld [vmem:[%s3517_s5 + $0x248] sm:$0xff]  ;;  %v1804_v25 = vld [vmem:[%s3517_s5 + $0x2c0] sm:$0xff]  ;;  %v1803_v27 = vld [vmem:[%s3517_s5 + $0x2b8] sm:$0xff] }
 0x20b   :  { %v1788_v26 = vld [vmem:[%s3517_s5 + $0x240] sm:$0xff]  ;;  %v1787_v28 = vld [vmem:[%s3517_s5 + $0x238] sm:$0xff] }
 0x20c   :  { %v2791_v34 = vadd.f32 %v241_v33, %v233_v29  ;;  %v2793_v35 = vadd.f32 %v241_v33, %v234_v30  ;;  %v2795_v36 = vadd.f32 %v241_v33, %v235_v31  ;;  %v2797_v37 = vadd.f32 %v241_v33, %v236_v32  ;;  %v1802_v29 = vld [vmem:[%s3517_s5 + $0x2b0] sm:$0xff]  ;;  %v1801_v31 = vld [vmem:[%s3517_s5 + $0x2a8] sm:$0xff]  ;;  %v1800_v33 = vld [vmem:[%s3517_s5 + $0x2a0] sm:$0xff] }
 0x20d   :  { %v1786_v30 = vld [vmem:[%s3517_s5 + $0x230] sm:$0xff]  ;;  %v1785_v32 = vld [vmem:[%s3517_s5 + $0x228] sm:$0xff] }
 0x20e   :  { %344 = vmatprep.mubr.f32.mxu0 %v2793_v35  ;;  %415 = vmatprep.mubr.f32.mxu1 %v2797_v37  ;;  %v458_v40 = vrot.slane %v2793_v35, 1  ;;  %v535_v41 = vrot.slane %v2797_v37, 1  ;;  %v457_v7 = vrot.slane %v2791_v34, 1  ;;  %v534_v8 = vrot.slane %v2795_v36, 1 }
 0x20f   :  { %345 = vmatmul.mubr.f32.vlgmr.msra.gmra.mxu0 %v2791_v34  ;;  %416 = vmatmul.mubr.f32.vlgmr.msra.gmra.mxu1 %v2795_v36  ;;  %v643_v11 = vrot.slane %v2793_v35, 2  ;;  %v718_v12 = vrot.slane %v2797_v37, 2 }
 0x210   :  { %2043 = vmatpush3.msra.mxu0 %v1763_v38  ;;  %2078 = vmatpush3.msra.mxu1 %v1763_v38  ;;  %v1784_v38 = vld [vmem:[%s3517_s5 + $0x220] sm:$0xff] }
 0x211   :  { %2044 = vmatprep.subr.mxu0 %v1778_v39  ;;  %525 = vmatprep.mubr.f32.mxu0 %v458_v40  ;;  %v1783_v40 = vld [vmem:[%s3517_s5 + $0x218] sm:$0xff] }
 0x212   :  { %2079 = vmatprep.subr.mxu1 %v1778_v39  ;;  %602 = vmatprep.mubr.f32.mxu1 %v535_v41  ;;  %v1799_v39 = vld [vmem:[%s3517_s5 + $0x298] sm:$0xff]  ;;  %v1798_v41 = vld [vmem:[%s3517_s5 + $0x290] sm:$0xff] }
 0x213   :  { %2045 = vmatpush3.msra.mxu0 %v1762_v42  ;;  %2080 = vmatpush3.msra.mxu1 %v1762_v42  ;;  %v1782_v42 = vld [vmem:[%s3517_s5 + $0x210] sm:$0xff] }
 0x214   :  { %2046 = vmatprep.subr.mxu0 %v1777_v43  ;;  %2081 = vmatprep.subr.mxu1 %v1777_v43  ;;  %v1797_v43 = vld [vmem:[%s3517_s5 + $0x288] sm:$0xff] }
 0x215   :  { %2047 = vmatpush3.msra.mxu0 %v1761_v44  ;;  %2082 = vmatpush3.msra.mxu1 %v1761_v44  ;;  %v1781_v44 = vld [vmem:[%s3517_s5 + $0x208] sm:$0xff] }
 0x216   :  { %2048 = vmatprep.subr.mxu0 %v1776_v45  ;;  %2083 = vmatprep.subr.mxu1 %v1776_v45  ;;  %v1796_v45 = vld [vmem:[%s3517_s5 + $0x280] sm:$0xff] }
 0x217   :  { %2049 = vmatpush3.msra.mxu0 %v1760_v46  ;;  %2084 = vmatpush3.msra.mxu1 %v1760_v46  ;;  %v1780_v46 = vld [vmem:[%s3517_s5 + $0x200] sm:$0xff] }
 0x218   :  { %2050 = vmatprep.subr.mxu0 %v1775_v47  ;;  %2085 = vmatprep.subr.mxu1 %v1775_v47  ;;  %v642_v47 = vrot.slane %v2791_v34, 2 }
 0x219   :  { %2051 = vmatpush3.msra.mxu0 %v1759_v48  ;;  %2086 = vmatpush3.msra.mxu1 %v1759_v48  ;;  %v717_v48 = vrot.slane %v2795_v36, 2 }
 0x21a   :  { %2052 = vmatprep.subr.mxu0 %v1774_v49  ;;  %2087 = vmatprep.subr.mxu1 %v1774_v49  ;;  %v1843_v49 = vld [vmem:[%s3517_s5 + $0x3f8] sm:$0xff] }
 0x21b   :  { %2053 = vmatpush3.msra.mxu0 %v1758_v50  ;;  %2088 = vmatpush3.msra.mxu1 %v1758_v50  ;;  %v1827_v50 = vld [vmem:[%s3517_s5 + $0x378] sm:$0xff] }
 0x21c   :  { %2054 = vmatprep.subr.mxu0 %v1773_v51  ;;  %2089 = vmatprep.subr.mxu1 %v1773_v51  ;;  %v826_v51 = vrot.slane %v2793_v35, 3 }
 0x21d   :  { %2055 = vmatpush3.msra.mxu0 %v1757_v52  ;;  %2090 = vmatpush3.msra.mxu1 %v1757_v52  ;;  %v901_v52 = vrot.slane %v2797_v37, 3 }
 0x21e   :  { %2056 = vmatprep.subr.mxu0 %v1772_v53  ;;  %2091 = vmatprep.subr.mxu1 %v1772_v53  ;;  %v1842_v53 = vld [vmem:[%s3517_s5 + $0x3f0] sm:$0xff] }
 0x21f   :  { %2057 = vmatpush3.msra.mxu0 %v1756_v54  ;;  %2092 = vmatpush3.msra.mxu1 %v1756_v54  ;;  %v1826_v54 = vld [vmem:[%s3517_s5 + $0x370] sm:$0xff] }
 0x220   :  { %2058 = vmatprep.subr.mxu0 %v1771_v55  ;;  %2093 = vmatprep.subr.mxu1 %v1771_v55  ;;  %v1841_v55 = vld [vmem:[%s3517_s5 + $0x3e8] sm:$0xff] }
 0x221   :  { %2059 = vmatpush3.msra.mxu0 %v1755_v56  ;;  %2094 = vmatpush3.msra.mxu1 %v1755_v56  ;;  %v1825_v56 = vld [vmem:[%s3517_s5 + $0x368] sm:$0xff] }
 0x222   :  { %2060 = vmatprep.subr.mxu0 %v1770_v57  ;;  %2095 = vmatprep.subr.mxu1 %v1770_v57  ;;  %v1840_v57 = vld [vmem:[%s3517_s5 + $0x3e0] sm:$0xff] }
 0x223   :  { %2061 = vmatpush3.msra.mxu0 %v1754_v58  ;;  %2096 = vmatpush3.msra.mxu1 %v1754_v58  ;;  %v1824_v58 = vld [vmem:[%s3517_s5 + $0x360] sm:$0xff] }
 0x224   :  { %2062 = vmatprep.subr.mxu0 %v1769_v59  ;;  %2097 = vmatprep.subr.mxu1 %v1769_v59  ;;  %v1839_v59 = vld [vmem:[%s3517_s5 + $0x3d8] sm:$0xff] }
 0x225   :  { %2063 = vmatpush3.msra.mxu0 %v1753_v60  ;;  %2098 = vmatpush3.msra.mxu1 %v1753_v60  ;;  %v1823_v60 = vld [vmem:[%s3517_s5 + $0x358] sm:$0xff] }
 0x226   :  { %2064 = vmatprep.subr.mxu0 %v1768_v61  ;;  %2099 = vmatprep.subr.mxu1 %v1768_v61  ;;  %v1838_v61 = vld [vmem:[%s3517_s5 + $0x3d0] sm:$0xff] }
 0x227   :  { %2065 = vmatpush3.msra.mxu0 %v1752_v62  ;;  %2100 = vmatpush3.msra.mxu1 %v1752_v62  ;;  %v1822_v62 = vld [vmem:[%s3517_s5 + $0x350] sm:$0xff] }
 0x228   :  { %2066 = vmatprep.subr.mxu0 %v1767_v63  ;;  %2101 = vmatprep.subr.mxu1 %v1767_v63  ;;  %v1837_v63 = vld [vmem:[%s3517_s5 + $0x3c8] sm:$0xff] }
 0x229   :  { %2067 = vmatpush3.msra.mxu0 %v1751_v0  ;;  %2102 = vmatpush3.msra.mxu1 %v1751_v0  ;;  %v1821_v0 = vld [vmem:[%s3517_s5 + $0x348] sm:$0xff] }
 0x22a   :  { %2068 = vmatprep.subr.mxu0 %v1766_v1  ;;  %2103 = vmatprep.subr.mxu1 %v1766_v1  ;;  %v1836_v1 = vld [vmem:[%s3517_s5 + $0x3c0] sm:$0xff] }
 0x22b   :  { %2069 = vmatpush3.msra.mxu0 %v1750_v2  ;;  %2104 = vmatpush3.msra.mxu1 %v1750_v2  ;;  %v1820_v2 = vld [vmem:[%s3517_s5 + $0x340] sm:$0xff] }
 0x22c   :  { %2070 = vmatprep.subr.mxu0 %v1765_v3  ;;  %2105 = vmatprep.subr.mxu1 %v1765_v3  ;;  %v1835_v3 = vld [vmem:[%s3517_s5 + $0x3b8] sm:$0xff] }
 0x22d   :  { %2071 = vmatpush3.msra.mxu0 %v1749_v4  ;;  %2106 = vmatpush3.msra.mxu1 %v1749_v4  ;;  %v1819_v4 = vld [vmem:[%s3517_s5 + $0x338] sm:$0xff] }
 0x22e   :  { %2072 = vmatprep.subr.mxu0 %v1764_v5  ;;  %2107 = vmatprep.subr.mxu1 %v1764_v5  ;;  %v1834_v5 = vld [vmem:[%s3517_s5 + $0x3b0] sm:$0xff] }
 0x22f   :  { %2073 = vmatpush3.msra.mxu0 %v1748_v6  ;;  %2108 = vmatpush3.msra.mxu1 %v1748_v6  ;;  %v1818_v6 = vld [vmem:[%s3517_s5 + $0x330] sm:$0xff] }
 0x230   :  { %526 = vmatmul.mubr.f32.vlgmr.msra.gmra.mxu0 %v457_v7  ;;  %603 = vmatmul.mubr.f32.vlgmr.msra.gmra.mxu1 %v534_v8  ;;  %v1833_v7 = vld [vmem:[%s3517_s5 + $0x3a8] sm:$0xff] }
 0x231   :  { %2112 = vmatprep.subr.mxu0 %v1811_v9  ;;  %2147 = vmatprep.subr.mxu1 %v1811_v9  ;;  %v1817_v8 = vld [vmem:[%s3517_s5 + $0x328] sm:$0xff]  ;;  %v1832_v9 = vld [vmem:[%s3517_s5 + $0x3a0] sm:$0xff] }
 0x232   :  { %2113 = vmatpush3.msra.mxu0 %v1795_v10  ;;  %710 = vmatprep.mubr.f32.mxu0 %v643_v11  ;;  %v1831_v11 = vld [vmem:[%s3517_s5 + $0x398] sm:$0xff] }
 0x233   :  { %2148 = vmatpush3.msra.mxu1 %v1795_v10  ;;  %785 = vmatprep.mubr.f32.mxu1 %v718_v12  ;;  %v1816_v10 = vld [vmem:[%s3517_s5 + $0x320] sm:$0xff]  ;;  %v1815_v12 = vld [vmem:[%s3517_s5 + $0x318] sm:$0xff] }
 0x234   :  { %2114 = vmatprep.subr.mxu0 %v1810_v13  ;;  %2149 = vmatprep.subr.mxu1 %v1810_v13  ;;  %v1830_v13 = vld [vmem:[%s3517_s5 + $0x390] sm:$0xff] }
 0x235   :  { %2115 = vmatpush3.msra.mxu0 %v1794_v14  ;;  %2150 = vmatpush3.msra.mxu1 %v1794_v14  ;;  %v1814_v14 = vld [vmem:[%s3517_s5 + $0x310] sm:$0xff] }
 0x236   :  { %2116 = vmatprep.subr.mxu0 %v1809_v15  ;;  %2151 = vmatprep.subr.mxu1 %v1809_v15  ;;  %v1829_v15 = vld [vmem:[%s3517_s5 + $0x388] sm:$0xff] }
 0x237   :  { %2117 = vmatpush3.msra.mxu0 %v1793_v16  ;;  %2152 = vmatpush3.msra.mxu1 %v1793_v16  ;;  %v1813_v16 = vld [vmem:[%s3517_s5 + $0x308] sm:$0xff] }
 0x238   :  { %2118 = vmatprep.subr.mxu0 %v1808_v17  ;;  %2153 = vmatprep.subr.mxu1 %v1808_v17  ;;  %v1828_v17 = vld [vmem:[%s3517_s5 + $0x380] sm:$0xff] }
 0x239   :  { %2119 = vmatpush3.msra.mxu0 %v1792_v18  ;;  %2154 = vmatpush3.msra.mxu1 %v1792_v18  ;;  %v1812_v18 = vld [vmem:[%s3517_s5 + $0x300] sm:$0xff] }
 0x23a   :  { %2120 = vmatprep.subr.mxu0 %v1807_v19  ;;  %2155 = vmatprep.subr.mxu1 %v1807_v19  ;;  %v825_v19 = vrot.slane %v2791_v34, 3 }
 0x23b   :  { %2121 = vmatpush3.msra.mxu0 %v1791_v20  ;;  %2156 = vmatpush3.msra.mxu1 %v1791_v20  ;;  %v900_v20 = vrot.slane %v2795_v36, 3 }
 0x23c   :  { %2122 = vmatprep.subr.mxu0 %v1806_v21  ;;  %2157 = vmatprep.subr.mxu1 %v1806_v21  ;;  %v1875_v21 = vld [vmem:[%s3517_s5 + $0x4f8] sm:$0xff] }
 0x23d   :  { %2123 = vmatpush3.msra.mxu0 %v1790_v22  ;;  %2158 = vmatpush3.msra.mxu1 %v1790_v22  ;;  %v1859_v22 = vld [vmem:[%s3517_s5 + $0x478] sm:$0xff] }
 0x23e   :  { %2124 = vmatprep.subr.mxu0 %v1805_v23  ;;  %2159 = vmatprep.subr.mxu1 %v1805_v23  ;;  %v1009_v23 = vrot.slane %v2793_v35, 4 }
 0x23f   :  { %2125 = vmatpush3.msra.mxu0 %v1789_v24  ;;  %2160 = vmatpush3.msra.mxu1 %v1789_v24  ;;  %v1084_v24 = vrot.slane %v2797_v37, 4 }
 0x240   :  { %2126 = vmatprep.subr.mxu0 %v1804_v25  ;;  %2161 = vmatprep.subr.mxu1 %v1804_v25  ;;  %v1874_v25 = vld [vmem:[%s3517_s5 + $0x4f0] sm:$0xff] }
 0x241   :  { %2127 = vmatpush3.msra.mxu0 %v1788_v26  ;;  %2162 = vmatpush3.msra.mxu1 %v1788_v26  ;;  %v1858_v26 = vld [vmem:[%s3517_s5 + $0x470] sm:$0xff] }
 0x242   :  { %2128 = vmatprep.subr.mxu0 %v1803_v27  ;;  %2163 = vmatprep.subr.mxu1 %v1803_v27  ;;  %v1873_v27 = vld [vmem:[%s3517_s5 + $0x4e8] sm:$0xff] }
 0x243   :  { %2129 = vmatpush3.msra.mxu0 %v1787_v28  ;;  %2164 = vmatpush3.msra.mxu1 %v1787_v28  ;;  %v1857_v28 = vld [vmem:[%s3517_s5 + $0x468] sm:$0xff] }
 0x244   :  { %2130 = vmatprep.subr.mxu0 %v1802_v29  ;;  %2165 = vmatprep.subr.mxu1 %v1802_v29  ;;  %v1872_v29 = vld [vmem:[%s3517_s5 + $0x4e0] sm:$0xff] }
 0x245   :  { %2131 = vmatpush3.msra.mxu0 %v1786_v30  ;;  %2166 = vmatpush3.msra.mxu1 %v1786_v30  ;;  %v1856_v30 = vld [vmem:[%s3517_s5 + $0x460] sm:$0xff] }
 0x246   :  { %2132 = vmatprep.subr.mxu0 %v1801_v31  ;;  %2167 = vmatprep.subr.mxu1 %v1801_v31  ;;  %v1871_v31 = vld [vmem:[%s3517_s5 + $0x4d8] sm:$0xff] }
 0x247   :  { %2133 = vmatpush3.msra.mxu0 %v1785_v32  ;;  %2168 = vmatpush3.msra.mxu1 %v1785_v32  ;;  %v1855_v32 = vld [vmem:[%s3517_s5 + $0x458] sm:$0xff] }
 0x248   :  { %2134 = vmatprep.subr.mxu0 %v1800_v33  ;;  %2169 = vmatprep.subr.mxu1 %v1800_v33  ;;  %v1870_v33 = vld [vmem:[%s3517_s5 + $0x4d0] sm:$0xff] }
 0x249   :  { %2135 = vmatpush3.msra.mxu0 %v1784_v38  ;;  %2170 = vmatpush3.msra.mxu1 %v1784_v38  ;;  %v1854_v38 = vld [vmem:[%s3517_s5 + $0x450] sm:$0xff] }
 0x24a   :  { %2136 = vmatprep.subr.mxu0 %v1799_v39  ;;  %2171 = vmatprep.subr.mxu1 %v1799_v39  ;;  %v1869_v39 = vld [vmem:[%s3517_s5 + $0x4c8] sm:$0xff] }
 0x24b   :  { %2137 = vmatpush3.msra.mxu0 %v1783_v40  ;;  %2172 = vmatpush3.msra.mxu1 %v1783_v40  ;;  %v1853_v40 = vld [vmem:[%s3517_s5 + $0x448] sm:$0xff] }
 0x24c   :  { %2138 = vmatprep.subr.mxu0 %v1798_v41  ;;  %2173 = vmatprep.subr.mxu1 %v1798_v41  ;;  %v1868_v41 = vld [vmem:[%s3517_s5 + $0x4c0] sm:$0xff] }
 0x24d   :  { %2139 = vmatpush3.msra.mxu0 %v1782_v42  ;;  %2174 = vmatpush3.msra.mxu1 %v1782_v42  ;;  %v1852_v42 = vld [vmem:[%s3517_s5 + $0x440] sm:$0xff] }
 0x24e   :  { %2140 = vmatprep.subr.mxu0 %v1797_v43  ;;  %2175 = vmatprep.subr.mxu1 %v1797_v43  ;;  %v1867_v43 = vld [vmem:[%s3517_s5 + $0x4b8] sm:$0xff] }
 0x24f   :  { %2141 = vmatpush3.msra.mxu0 %v1781_v44  ;;  %2176 = vmatpush3.msra.mxu1 %v1781_v44  ;;  %v1851_v44 = vld [vmem:[%s3517_s5 + $0x438] sm:$0xff] }
 0x250   :  { %2142 = vmatprep.subr.mxu0 %v1796_v45  ;;  %2177 = vmatprep.subr.mxu1 %v1796_v45  ;;  %v1866_v45 = vld [vmem:[%s3517_s5 + $0x4b0] sm:$0xff] }
 0x251   :  { %2143 = vmatpush3.msra.mxu0 %v1780_v46  ;;  %2178 = vmatpush3.msra.mxu1 %v1780_v46  ;;  %v1850_v46 = vld [vmem:[%s3517_s5 + $0x430] sm:$0xff] }
 0x252   :  { %711 = vmatmul.mubr.f32.vlgmr.msra.gmra.mxu0 %v642_v47  ;;  %786 = vmatmul.mubr.f32.vlgmr.msra.gmra.mxu1 %v717_v48  ;;  %v1865_v47 = vld [vmem:[%s3517_s5 + $0x4a8] sm:$0xff] }
 0x253   :  { %2182 = vmatprep.subr.mxu0 %v1843_v49  ;;  %2217 = vmatprep.subr.mxu1 %v1843_v49  ;;  %v1849_v48 = vld [vmem:[%s3517_s5 + $0x428] sm:$0xff]  ;;  %v1864_v49 = vld [vmem:[%s3517_s5 + $0x4a0] sm:$0xff] }
 0x254   :  { %2183 = vmatpush3.msra.mxu0 %v1827_v50  ;;  %893 = vmatprep.mubr.f32.mxu0 %v826_v51  ;;  %v1863_v51 = vld [vmem:[%s3517_s5 + $0x498] sm:$0xff] }
 0x255   :  { %2218 = vmatpush3.msra.mxu1 %v1827_v50  ;;  %968 = vmatprep.mubr.f32.mxu1 %v901_v52  ;;  %v1848_v50 = vld [vmem:[%s3517_s5 + $0x420] sm:$0xff]  ;;  %v1847_v52 = vld [vmem:[%s3517_s5 + $0x418] sm:$0xff] }
 0x256   :  { %2184 = vmatprep.subr.mxu0 %v1842_v53  ;;  %2219 = vmatprep.subr.mxu1 %v1842_v53  ;;  %v1862_v53 = vld [vmem:[%s3517_s5 + $0x490] sm:$0xff] }
 0x257   :  { %2185 = vmatpush3.msra.mxu0 %v1826_v54  ;;  %2220 = vmatpush3.msra.mxu1 %v1826_v54  ;;  %v1846_v54 = vld [vmem:[%s3517_s5 + $0x410] sm:$0xff] }
 0x258   :  { %2186 = vmatprep.subr.mxu0 %v1841_v55  ;;  %2221 = vmatprep.subr.mxu1 %v1841_v55  ;;  %v1861_v55 = vld [vmem:[%s3517_s5 + $0x488] sm:$0xff] }
 0x259   :  { %2187 = vmatpush3.msra.mxu0 %v1825_v56  ;;  %2222 = vmatpush3.msra.mxu1 %v1825_v56  ;;  %v1845_v56 = vld [vmem:[%s3517_s5 + $0x408] sm:$0xff] }
 0x25a   :  { %2188 = vmatprep.subr.mxu0 %v1840_v57  ;;  %2223 = vmatprep.subr.mxu1 %v1840_v57  ;;  %v1860_v57 = vld [vmem:[%s3517_s5 + $0x480] sm:$0xff] }
 0x25b   :  { %2189 = vmatpush3.msra.mxu0 %v1824_v58  ;;  %2224 = vmatpush3.msra.mxu1 %v1824_v58  ;;  %v1844_v58 = vld [vmem:[%s3517_s5 + $0x400] sm:$0xff] }
 0x25c   :  { %2190 = vmatprep.subr.mxu0 %v1839_v59  ;;  %2225 = vmatprep.subr.mxu1 %v1839_v59  ;;  %v1008_v59 = vrot.slane %v2791_v34, 4 }
 0x25d   :  { %2191 = vmatpush3.msra.mxu0 %v1823_v60  ;;  %2226 = vmatpush3.msra.mxu1 %v1823_v60  ;;  %v1083_v60 = vrot.slane %v2795_v36, 4 }
 0x25e   :  { %2192 = vmatprep.subr.mxu0 %v1838_v61  ;;  %2227 = vmatprep.subr.mxu1 %v1838_v61  ;;  %v1907_v61 = vld [vmem:[%s3517_s5 + $0x5f8] sm:$0xff] }
 0x25f   :  { %2193 = vmatpush3.msra.mxu0 %v1822_v62  ;;  %2228 = vmatpush3.msra.mxu1 %v1822_v62  ;;  %v1891_v62 = vld [vmem:[%s3517_s5 + $0x578] sm:$0xff] }
 0x260   :  { %2194 = vmatprep.subr.mxu0 %v1837_v63  ;;  %2229 = vmatprep.subr.mxu1 %v1837_v63  ;;  %v1192_v63 = vrot.slane %v2793_v35, 5 }
 0x261   :  { %2195 = vmatpush3.msra.mxu0 %v1821_v0  ;;  %2230 = vmatpush3.msra.mxu1 %v1821_v0  ;;  %v1267_v0 = vrot.slane %v2797_v37, 5 }
 0x262   :  { %2196 = vmatprep.subr.mxu0 %v1836_v1  ;;  %2231 = vmatprep.subr.mxu1 %v1836_v1  ;;  %v1906_v1 = vld [vmem:[%s3517_s5 + $0x5f0] sm:$0xff] }
 0x263   :  { %2197 = vmatpush3.msra.mxu0 %v1820_v2  ;;  %2232 = vmatpush3.msra.mxu1 %v1820_v2  ;;  %v1890_v2 = vld [vmem:[%s3517_s5 + $0x570] sm:$0xff] }
 0x264   :  { %2198 = vmatprep.subr.mxu0 %v1835_v3  ;;  %2233 = vmatprep.subr.mxu1 %v1835_v3  ;;  %v1905_v3 = vld [vmem:[%s3517_s5 + $0x5e8] sm:$0xff] }
 0x265   :  { %2199 = vmatpush3.msra.mxu0 %v1819_v4  ;;  %2234 = vmatpush3.msra.mxu1 %v1819_v4  ;;  %v1889_v4 = vld [vmem:[%s3517_s5 + $0x568] sm:$0xff] }
 0x266   :  { %2200 = vmatprep.subr.mxu0 %v1834_v5  ;;  %2235 = vmatprep.subr.mxu1 %v1834_v5  ;;  %v1904_v5 = vld [vmem:[%s3517_s5 + $0x5e0] sm:$0xff] }
 0x267   :  { %2201 = vmatpush3.msra.mxu0 %v1818_v6  ;;  %2236 = vmatpush3.msra.mxu1 %v1818_v6  ;;  %v1888_v6 = vld [vmem:[%s3517_s5 + $0x560] sm:$0xff] }
 0x268   :  { %2202 = vmatprep.subr.mxu0 %v1833_v7  ;;  %2237 = vmatprep.subr.mxu1 %v1833_v7  ;;  %v1903_v7 = vld [vmem:[%s3517_s5 + $0x5d8] sm:$0xff] }
 0x269   :  { %2203 = vmatpush3.msra.mxu0 %v1817_v8  ;;  %2238 = vmatpush3.msra.mxu1 %v1817_v8  ;;  %v1887_v8 = vld [vmem:[%s3517_s5 + $0x558] sm:$0xff] }
 0x26a   :  { %2204 = vmatprep.subr.mxu0 %v1832_v9  ;;  %2239 = vmatprep.subr.mxu1 %v1832_v9  ;;  %v1902_v9 = vld [vmem:[%s3517_s5 + $0x5d0] sm:$0xff] }
 0x26b   :  { %2205 = vmatpush3.msra.mxu0 %v1816_v10  ;;  %2240 = vmatpush3.msra.mxu1 %v1816_v10  ;;  %v1886_v10 = vld [vmem:[%s3517_s5 + $0x550] sm:$0xff] }
 0x26c   :  { %2206 = vmatprep.subr.mxu0 %v1831_v11  ;;  %2241 = vmatprep.subr.mxu1 %v1831_v11  ;;  %v1901_v11 = vld [vmem:[%s3517_s5 + $0x5c8] sm:$0xff] }
 0x26d   :  { %2207 = vmatpush3.msra.mxu0 %v1815_v12  ;;  %2242 = vmatpush3.msra.mxu1 %v1815_v12  ;;  %v1885_v12 = vld [vmem:[%s3517_s5 + $0x548] sm:$0xff] }
 0x26e   :  { %2208 = vmatprep.subr.mxu0 %v1830_v13  ;;  %2243 = vmatprep.subr.mxu1 %v1830_v13  ;;  %v1900_v13 = vld [vmem:[%s3517_s5 + $0x5c0] sm:$0xff] }
 0x26f   :  { %2209 = vmatpush3.msra.mxu0 %v1814_v14  ;;  %2244 = vmatpush3.msra.mxu1 %v1814_v14  ;;  %v1884_v14 = vld [vmem:[%s3517_s5 + $0x540] sm:$0xff] }
 0x270   :  { %2210 = vmatprep.subr.mxu0 %v1829_v15  ;;  %2245 = vmatprep.subr.mxu1 %v1829_v15  ;;  %v1899_v15 = vld [vmem:[%s3517_s5 + $0x5b8] sm:$0xff] }
 0x271   :  { %2211 = vmatpush3.msra.mxu0 %v1813_v16  ;;  %2246 = vmatpush3.msra.mxu1 %v1813_v16  ;;  %v1883_v16 = vld [vmem:[%s3517_s5 + $0x538] sm:$0xff] }
 0x272   :  { %2212 = vmatprep.subr.mxu0 %v1828_v17  ;;  %2247 = vmatprep.subr.mxu1 %v1828_v17  ;;  %v1898_v17 = vld [vmem:[%s3517_s5 + $0x5b0] sm:$0xff] }
 0x273   :  { %2213 = vmatpush3.msra.mxu0 %v1812_v18  ;;  %2248 = vmatpush3.msra.mxu1 %v1812_v18  ;;  %v1882_v18 = vld [vmem:[%s3517_s5 + $0x530] sm:$0xff] }
 0x274   :  { %894 = vmatmul.mubr.f32.vlgmr.msra.gmra.mxu0 %v825_v19  ;;  %969 = vmatmul.mubr.f32.vlgmr.msra.gmra.mxu1 %v900_v20  ;;  %v1897_v19 = vld [vmem:[%s3517_s5 + $0x5a8] sm:$0xff] }
 0x275   :  { %2252 = vmatprep.subr.mxu0 %v1875_v21  ;;  %2287 = vmatprep.subr.mxu1 %v1875_v21  ;;  %v1881_v20 = vld [vmem:[%s3517_s5 + $0x528] sm:$0xff]  ;;  %v1896_v21 = vld [vmem:[%s3517_s5 + $0x5a0] sm:$0xff] }
 0x276   :  { %2253 = vmatpush3.msra.mxu0 %v1859_v22  ;;  %1076 = vmatprep.mubr.f32.mxu0 %v1009_v23  ;;  %v1895_v23 = vld [vmem:[%s3517_s5 + $0x598] sm:$0xff] }
 0x277   :  { %2288 = vmatpush3.msra.mxu1 %v1859_v22  ;;  %1151 = vmatprep.mubr.f32.mxu1 %v1084_v24  ;;  %v1880_v22 = vld [vmem:[%s3517_s5 + $0x520] sm:$0xff]  ;;  %v1879_v24 = vld [vmem:[%s3517_s5 + $0x518] sm:$0xff] }
 0x278   :  { %2254 = vmatprep.subr.mxu0 %v1874_v25  ;;  %2289 = vmatprep.subr.mxu1 %v1874_v25  ;;  %v1894_v25 = vld [vmem:[%s3517_s5 + $0x590] sm:$0xff] }
 0x279   :  { %2255 = vmatpush3.msra.mxu0 %v1858_v26  ;;  %2290 = vmatpush3.msra.mxu1 %v1858_v26  ;;  %v1878_v26 = vld [vmem:[%s3517_s5 + $0x510] sm:$0xff] }
 0x27a   :  { %2256 = vmatprep.subr.mxu0 %v1873_v27  ;;  %2291 = vmatprep.subr.mxu1 %v1873_v27  ;;  %v1893_v27 = vld [vmem:[%s3517_s5 + $0x588] sm:$0xff] }
 0x27b   :  { %2257 = vmatpush3.msra.mxu0 %v1857_v28  ;;  %2292 = vmatpush3.msra.mxu1 %v1857_v28  ;;  %v1877_v28 = vld [vmem:[%s3517_s5 + $0x508] sm:$0xff] }
 0x27c   :  { %2258 = vmatprep.subr.mxu0 %v1872_v29  ;;  %2293 = vmatprep.subr.mxu1 %v1872_v29  ;;  %v1892_v29 = vld [vmem:[%s3517_s5 + $0x580] sm:$0xff] }
 0x27d   :  { %2259 = vmatpush3.msra.mxu0 %v1856_v30  ;;  %2294 = vmatpush3.msra.mxu1 %v1856_v30  ;;  %v1876_v30 = vld [vmem:[%s3517_s5 + $0x500] sm:$0xff] }
 0x27e   :  { %2260 = vmatprep.subr.mxu0 %v1871_v31  ;;  %2295 = vmatprep.subr.mxu1 %v1871_v31  ;;  %v1191_v31 = vrot.slane %v2791_v34, 5 }
 0x27f   :  { %2261 = vmatpush3.msra.mxu0 %v1855_v32  ;;  %2296 = vmatpush3.msra.mxu1 %v1855_v32  ;;  %v1266_v32 = vrot.slane %v2795_v36, 5 }
 0x280   :  { %2262 = vmatprep.subr.mxu0 %v1870_v33  ;;  %2297 = vmatprep.subr.mxu1 %v1870_v33  ;;  %v1939_v33 = vld [vmem:[%s3517_s5 + $0x6f8] sm:$0xff] }
 0x281   :  { %2263 = vmatpush3.msra.mxu0 %v1854_v38  ;;  %2298 = vmatpush3.msra.mxu1 %v1854_v38  ;;  %v1923_v38 = vld [vmem:[%s3517_s5 + $0x678] sm:$0xff] }
 0x282   :  { %2264 = vmatprep.subr.mxu0 %v1869_v39  ;;  %2299 = vmatprep.subr.mxu1 %v1869_v39  ;;  %v1375_v39 = vrot.slane %v2793_v35, 6 }
 0x283   :  { %2265 = vmatpush3.msra.mxu0 %v1853_v40  ;;  %2300 = vmatpush3.msra.mxu1 %v1853_v40  ;;  %v1450_v40 = vrot.slane %v2797_v37, 6 }
 0x284   :  { %2266 = vmatprep.subr.mxu0 %v1868_v41  ;;  %2301 = vmatprep.subr.mxu1 %v1868_v41  ;;  %v1938_v41 = vld [vmem:[%s3517_s5 + $0x6f0] sm:$0xff] }
 0x285   :  { %2267 = vmatpush3.msra.mxu0 %v1852_v42  ;;  %2302 = vmatpush3.msra.mxu1 %v1852_v42  ;;  %v1922_v42 = vld [vmem:[%s3517_s5 + $0x670] sm:$0xff] }
 0x286   :  { %2268 = vmatprep.subr.mxu0 %v1867_v43  ;;  %2303 = vmatprep.subr.mxu1 %v1867_v43  ;;  %v1937_v43 = vld [vmem:[%s3517_s5 + $0x6e8] sm:$0xff] }
 0x287   :  { %2269 = vmatpush3.msra.mxu0 %v1851_v44  ;;  %2304 = vmatpush3.msra.mxu1 %v1851_v44  ;;  %v1921_v44 = vld [vmem:[%s3517_s5 + $0x668] sm:$0xff] }
 0x288   :  { %2270 = vmatprep.subr.mxu0 %v1866_v45  ;;  %2305 = vmatprep.subr.mxu1 %v1866_v45  ;;  %v1936_v45 = vld [vmem:[%s3517_s5 + $0x6e0] sm:$0xff] }
 0x289   :  { %2271 = vmatpush3.msra.mxu0 %v1850_v46  ;;  %2306 = vmatpush3.msra.mxu1 %v1850_v46  ;;  %v1920_v46 = vld [vmem:[%s3517_s5 + $0x660] sm:$0xff] }
 0x28a   :  { %2272 = vmatprep.subr.mxu0 %v1865_v47  ;;  %2307 = vmatprep.subr.mxu1 %v1865_v47  ;;  %v1935_v47 = vld [vmem:[%s3517_s5 + $0x6d8] sm:$0xff] }
 0x28b   :  { %2273 = vmatpush3.msra.mxu0 %v1849_v48  ;;  %2308 = vmatpush3.msra.mxu1 %v1849_v48  ;;  %v1919_v48 = vld [vmem:[%s3517_s5 + $0x658] sm:$0xff] }
 0x28c   :  { %2274 = vmatprep.subr.mxu0 %v1864_v49  ;;  %2309 = vmatprep.subr.mxu1 %v1864_v49  ;;  %v1934_v49 = vld [vmem:[%s3517_s5 + $0x6d0] sm:$0xff] }
 0x28d   :  { %2275 = vmatpush3.msra.mxu0 %v1848_v50  ;;  %2310 = vmatpush3.msra.mxu1 %v1848_v50  ;;  %v1918_v50 = vld [vmem:[%s3517_s5 + $0x650] sm:$0xff] }
 0x28e   :  { %2276 = vmatprep.subr.mxu0 %v1863_v51  ;;  %2311 = vmatprep.subr.mxu1 %v1863_v51  ;;  %v1933_v51 = vld [vmem:[%s3517_s5 + $0x6c8] sm:$0xff] }
 0x28f   :  { %2277 = vmatpush3.msra.mxu0 %v1847_v52  ;;  %2312 = vmatpush3.msra.mxu1 %v1847_v52  ;;  %v1917_v52 = vld [vmem:[%s3517_s5 + $0x648] sm:$0xff] }
 0x290   :  { %2278 = vmatprep.subr.mxu0 %v1862_v53  ;;  %2313 = vmatprep.subr.mxu1 %v1862_v53  ;;  %v1932_v53 = vld [vmem:[%s3517_s5 + $0x6c0] sm:$0xff] }
 0x291   :  { %2279 = vmatpush3.msra.mxu0 %v1846_v54  ;;  %2314 = vmatpush3.msra.mxu1 %v1846_v54  ;;  %v1916_v54 = vld [vmem:[%s3517_s5 + $0x640] sm:$0xff] }
 0x292   :  { %2280 = vmatprep.subr.mxu0 %v1861_v55  ;;  %2315 = vmatprep.subr.mxu1 %v1861_v55  ;;  %v1931_v55 = vld [vmem:[%s3517_s5 + $0x6b8] sm:$0xff] }
 0x293   :  { %2281 = vmatpush3.msra.mxu0 %v1845_v56  ;;  %2316 = vmatpush3.msra.mxu1 %v1845_v56  ;;  %v1915_v56 = vld [vmem:[%s3517_s5 + $0x638] sm:$0xff] }
 0x294   :  { %2282 = vmatprep.subr.mxu0 %v1860_v57  ;;  %2317 = vmatprep.subr.mxu1 %v1860_v57  ;;  %v1930_v57 = vld [vmem:[%s3517_s5 + $0x6b0] sm:$0xff] }
 0x295   :  { %2283 = vmatpush3.msra.mxu0 %v1844_v58  ;;  %2318 = vmatpush3.msra.mxu1 %v1844_v58  ;;  %v1914_v58 = vld [vmem:[%s3517_s5 + $0x630] sm:$0xff] }
 0x296   :  { %1077 = vmatmul.mubr.f32.vlgmr.msra.gmra.mxu0 %v1008_v59  ;;  %1152 = vmatmul.mubr.f32.vlgmr.msra.gmra.mxu1 %v1083_v60  ;;  %v1929_v59 = vld [vmem:[%s3517_s5 + $0x6a8] sm:$0xff] }
 0x297   :  { %2322 = vmatprep.subr.mxu0 %v1907_v61  ;;  %2357 = vmatprep.subr.mxu1 %v1907_v61  ;;  %v1913_v60 = vld [vmem:[%s3517_s5 + $0x628] sm:$0xff]  ;;  %v1928_v61 = vld [vmem:[%s3517_s5 + $0x6a0] sm:$0xff] }
 0x298   :  { %2323 = vmatpush3.msra.mxu0 %v1891_v62  ;;  %1259 = vmatprep.mubr.f32.mxu0 %v1192_v63  ;;  %v1927_v63 = vld [vmem:[%s3517_s5 + $0x698] sm:$0xff] }
 0x299   :  { %2358 = vmatpush3.msra.mxu1 %v1891_v62  ;;  %1334 = vmatprep.mubr.f32.mxu1 %v1267_v0  ;;  %v1912_v62 = vld [vmem:[%s3517_s5 + $0x620] sm:$0xff]  ;;  %v1911_v0 = vld [vmem:[%s3517_s5 + $0x618] sm:$0xff] }
 0x29a   :  { %2324 = vmatprep.subr.mxu0 %v1906_v1  ;;  %2359 = vmatprep.subr.mxu1 %v1906_v1  ;;  %v1926_v1 = vld [vmem:[%s3517_s5 + $0x690] sm:$0xff] }
 0x29b   :  { %2325 = vmatpush3.msra.mxu0 %v1890_v2  ;;  %2360 = vmatpush3.msra.mxu1 %v1890_v2  ;;  %v1910_v2 = vld [vmem:[%s3517_s5 + $0x610] sm:$0xff] }
 0x29c   :  { %2326 = vmatprep.subr.mxu0 %v1905_v3  ;;  %2361 = vmatprep.subr.mxu1 %v1905_v3  ;;  %v1925_v3 = vld [vmem:[%s3517_s5 + $0x688] sm:$0xff] }
 0x29d   :  { %2327 = vmatpush3.msra.mxu0 %v1889_v4  ;;  %2362 = vmatpush3.msra.mxu1 %v1889_v4  ;;  %v1909_v4 = vld [vmem:[%s3517_s5 + $0x608] sm:$0xff] }
 0x29e   :  { %2328 = vmatprep.subr.mxu0 %v1904_v5  ;;  %2363 = vmatprep.subr.mxu1 %v1904_v5  ;;  %v1924_v5 = vld [vmem:[%s3517_s5 + $0x680] sm:$0xff] }
 0x29f   :  { %2329 = vmatpush3.msra.mxu0 %v1888_v6  ;;  %2364 = vmatpush3.msra.mxu1 %v1888_v6  ;;  %v1908_v6 = vld [vmem:[%s3517_s5 + $0x600] sm:$0xff] }
 0x2a0   :  { %2330 = vmatprep.subr.mxu0 %v1903_v7  ;;  %2365 = vmatprep.subr.mxu1 %v1903_v7  ;;  %v1374_v7 = vrot.slane %v2791_v34, 6 }
 0x2a1   :  { %2331 = vmatpush3.msra.mxu0 %v1887_v8  ;;  %2366 = vmatpush3.msra.mxu1 %v1887_v8  ;;  %v1449_v8 = vrot.slane %v2795_v36, 6 }
 0x2a2   :  { %2332 = vmatprep.subr.mxu0 %v1902_v9  ;;  %2367 = vmatprep.subr.mxu1 %v1902_v9  ;;  %v1971_v9 = vld [vmem:[%s3517_s5 + $0x7f8] sm:$0xff] }
 0x2a3   :  { %2333 = vmatpush3.msra.mxu0 %v1886_v10  ;;  %2368 = vmatpush3.msra.mxu1 %v1886_v10  ;;  %v1955_v10 = vld [vmem:[%s3517_s5 + $0x778] sm:$0xff] }
 0x2a4   :  { %2334 = vmatprep.subr.mxu0 %v1901_v11  ;;  %2369 = vmatprep.subr.mxu1 %v1901_v11  ;;  %v1558_v11 = vrot.slane %v2793_v35, 7  ;;  %v1969_v35 = vld [vmem:[%s3517_s5 + $0x7e8] sm:$0xff] }
 0x2a5   :  { %2335 = vmatpush3.msra.mxu0 %v1885_v12  ;;  %2370 = vmatpush3.msra.mxu1 %v1885_v12  ;;  %v1633_v12 = vrot.slane %v2797_v37, 7  ;;  %v1953_v37 = vld [vmem:[%s3517_s5 + $0x768] sm:$0xff] }
 0x2a6   :  { %2336 = vmatprep.subr.mxu0 %v1900_v13  ;;  %2371 = vmatprep.subr.mxu1 %v1900_v13  ;;  %v1970_v13 = vld [vmem:[%s3517_s5 + $0x7f0] sm:$0xff] }
 0x2a7   :  { %2337 = vmatpush3.msra.mxu0 %v1884_v14  ;;  %2372 = vmatpush3.msra.mxu1 %v1884_v14  ;;  %v1954_v14 = vld [vmem:[%s3517_s5 + $0x770] sm:$0xff] }
 0x2a8   :  { %2338 = vmatprep.subr.mxu0 %v1899_v15  ;;  %2373 = vmatprep.subr.mxu1 %v1899_v15  ;;  %v1968_v15 = vld [vmem:[%s3517_s5 + $0x7e0] sm:$0xff] }
 0x2a9   :  { %2339 = vmatpush3.msra.mxu0 %v1883_v16  ;;  %2374 = vmatpush3.msra.mxu1 %v1883_v16  ;;  %v1952_v16 = vld [vmem:[%s3517_s5 + $0x760] sm:$0xff] }
 0x2aa   :  { %2340 = vmatprep.subr.mxu0 %v1898_v17  ;;  %2375 = vmatprep.subr.mxu1 %v1898_v17  ;;  %v1967_v17 = vld [vmem:[%s3517_s5 + $0x7d8] sm:$0xff] }
 0x2ab   :  { %2341 = vmatpush3.msra.mxu0 %v1882_v18  ;;  %2376 = vmatpush3.msra.mxu1 %v1882_v18  ;;  %v1951_v18 = vld [vmem:[%s3517_s5 + $0x758] sm:$0xff] }
 0x2ac   :  { %2342 = vmatprep.subr.mxu0 %v1897_v19  ;;  %2377 = vmatprep.subr.mxu1 %v1897_v19  ;;  %v1966_v19 = vld [vmem:[%s3517_s5 + $0x7d0] sm:$0xff] }
 0x2ad   :  { %2343 = vmatpush3.msra.mxu0 %v1881_v20  ;;  %2378 = vmatpush3.msra.mxu1 %v1881_v20  ;;  %v1950_v20 = vld [vmem:[%s3517_s5 + $0x750] sm:$0xff] }
 0x2ae   :  { %2344 = vmatprep.subr.mxu0 %v1896_v21  ;;  %2379 = vmatprep.subr.mxu1 %v1896_v21  ;;  %v1965_v21 = vld [vmem:[%s3517_s5 + $0x7c8] sm:$0xff] }
 0x2af   :  { %2345 = vmatpush3.msra.mxu0 %v1880_v22  ;;  %2380 = vmatpush3.msra.mxu1 %v1880_v22  ;;  %v1949_v22 = vld [vmem:[%s3517_s5 + $0x748] sm:$0xff] }
 0x2b0   :  { %2346 = vmatprep.subr.mxu0 %v1895_v23  ;;  %2381 = vmatprep.subr.mxu1 %v1895_v23  ;;  %v1964_v23 = vld [vmem:[%s3517_s5 + $0x7c0] sm:$0xff] }
 0x2b1   :  { %2347 = vmatpush3.msra.mxu0 %v1879_v24  ;;  %2382 = vmatpush3.msra.mxu1 %v1879_v24  ;;  %v1948_v24 = vld [vmem:[%s3517_s5 + $0x740] sm:$0xff] }
 0x2b2   :  { %2348 = vmatprep.subr.mxu0 %v1894_v25  ;;  %2383 = vmatprep.subr.mxu1 %v1894_v25  ;;  %v1963_v25 = vld [vmem:[%s3517_s5 + $0x7b8] sm:$0xff] }
 0x2b3   :  { %2349 = vmatpush3.msra.mxu0 %v1878_v26  ;;  %2384 = vmatpush3.msra.mxu1 %v1878_v26  ;;  %v1947_v26 = vld [vmem:[%s3517_s5 + $0x738] sm:$0xff] }
 0x2b4   :  { %2350 = vmatprep.subr.mxu0 %v1893_v27  ;;  %2385 = vmatprep.subr.mxu1 %v1893_v27  ;;  %v1962_v27 = vld [vmem:[%s3517_s5 + $0x7b0] sm:$0xff] }
 0x2b5   :  { %2351 = vmatpush3.msra.mxu0 %v1877_v28  ;;  %2386 = vmatpush3.msra.mxu1 %v1877_v28  ;;  %v1946_v28 = vld [vmem:[%s3517_s5 + $0x730] sm:$0xff] }
 0x2b6   :  { %2352 = vmatprep.subr.mxu0 %v1892_v29  ;;  %2387 = vmatprep.subr.mxu1 %v1892_v29  ;;  %v1961_v29 = vld [vmem:[%s3517_s5 + $0x7a8] sm:$0xff] }
 0x2b7   :  { %2353 = vmatpush3.msra.mxu0 %v1876_v30  ;;  %2388 = vmatpush3.msra.mxu1 %v1876_v30  ;;  %v1945_v30 = vld [vmem:[%s3517_s5 + $0x728] sm:$0xff] }
 0x2b8   :  { %1260 = vmatmul.mubr.f32.vlgmr.msra.gmra.mxu0 %v1191_v31  ;;  %1335 = vmatmul.mubr.f32.vlgmr.msra.gmra.mxu1 %v1266_v32  ;;  %v1960_v31 = vld [vmem:[%s3517_s5 + $0x7a0] sm:$0xff] }
 0x2b9   :  { %2392 = vmatprep.subr.mxu0 %v1939_v33  ;;  %2427 = vmatprep.subr.mxu1 %v1939_v33  ;;  %v1944_v32 = vld [vmem:[%s3517_s5 + $0x720] sm:$0xff]  ;;  %v1959_v33 = vld [vmem:[%s3517_s5 + $0x798] sm:$0xff] }
 0x2ba   :  { %2393 = vmatpush3.msra.mxu0 %v1923_v38  ;;  %1442 = vmatprep.mubr.f32.mxu0 %v1375_v39  ;;  %v1958_v39 = vld [vmem:[%s3517_s5 + $0x790] sm:$0xff] }
 0x2bb   :  { %2428 = vmatpush3.msra.mxu1 %v1923_v38  ;;  %1517 = vmatprep.mubr.f32.mxu1 %v1450_v40  ;;  %v1943_v38 = vld [vmem:[%s3517_s5 + $0x718] sm:$0xff]  ;;  %v1942_v40 = vld [vmem:[%s3517_s5 + $0x710] sm:$0xff] }
 0x2bc   :  { %2394 = vmatprep.subr.mxu0 %v1938_v41  ;;  %2429 = vmatprep.subr.mxu1 %v1938_v41  ;;  %v1957_v41 = vld [vmem:[%s3517_s5 + $0x788] sm:$0xff] }
 0x2bd   :  { %2395 = vmatpush3.msra.mxu0 %v1922_v42  ;;  %2430 = vmatpush3.msra.mxu1 %v1922_v42  ;;  %v1941_v42 = vld [vmem:[%s3517_s5 + $0x708] sm:$0xff] }
 0x2be   :  { %2396 = vmatprep.subr.mxu0 %v1937_v43  ;;  %2431 = vmatprep.subr.mxu1 %v1937_v43  ;;  %v1956_v43 = vld [vmem:[%s3517_s5 + $0x780] sm:$0xff] }
 0x2bf   :  { %2397 = vmatpush3.msra.mxu0 %v1921_v44  ;;  %2432 = vmatpush3.msra.mxu1 %v1921_v44  ;;  %v1940_v44 = vld [vmem:[%s3517_s5 + $0x700] sm:$0xff] }
 0x2c0   :  { %2398 = vmatprep.subr.mxu0 %v1936_v45  ;;  %2433 = vmatprep.subr.mxu1 %v1936_v45  ;;  %v1557_v45 = vrot.slane %v2791_v34, 7 }
 0x2c1   :  { %2399 = vmatpush3.msra.mxu0 %v1920_v46  ;;  %2434 = vmatpush3.msra.mxu1 %v1920_v46  ;;  %v1632_v46 = vrot.slane %v2795_v36, 7 }
 0x2c2   :  { %2400 = vmatprep.subr.mxu0 %v1935_v47  ;;  %2435 = vmatprep.subr.mxu1 %v1935_v47 }
 0x2c3   :  { %2401 = vmatpush3.msra.mxu0 %v1919_v48  ;;  %2436 = vmatpush3.msra.mxu1 %v1919_v48 }
 0x2c4   :  { %2402 = vmatprep.subr.mxu0 %v1934_v49  ;;  %2437 = vmatprep.subr.mxu1 %v1934_v49 }
 0x2c5   :  { %2403 = vmatpush3.msra.mxu0 %v1918_v50  ;;  %2438 = vmatpush3.msra.mxu1 %v1918_v50 }
 0x2c6   :  { %2404 = vmatprep.subr.mxu0 %v1933_v51  ;;  %2439 = vmatprep.subr.mxu1 %v1933_v51 }
 0x2c7   :  { %2405 = vmatpush3.msra.mxu0 %v1917_v52  ;;  %2440 = vmatpush3.msra.mxu1 %v1917_v52 }
 0x2c8   :  { %2406 = vmatprep.subr.mxu0 %v1932_v53  ;;  %2441 = vmatprep.subr.mxu1 %v1932_v53 }
 0x2c9   :  { %2407 = vmatpush3.msra.mxu0 %v1916_v54  ;;  %2442 = vmatpush3.msra.mxu1 %v1916_v54 }
 0x2ca   :  { %2408 = vmatprep.subr.mxu0 %v1931_v55  ;;  %2443 = vmatprep.subr.mxu1 %v1931_v55 }
 0x2cb   :  { %2409 = vmatpush3.msra.mxu0 %v1915_v56  ;;  %2444 = vmatpush3.msra.mxu1 %v1915_v56 }
 0x2cc   :  { %2410 = vmatprep.subr.mxu0 %v1930_v57  ;;  %2445 = vmatprep.subr.mxu1 %v1930_v57 }
 0x2cd   :  { %2411 = vmatpush3.msra.mxu0 %v1914_v58  ;;  %2446 = vmatpush3.msra.mxu1 %v1914_v58 }
 0x2ce   :  { %2412 = vmatprep.subr.mxu0 %v1929_v59  ;;  %2447 = vmatprep.subr.mxu1 %v1929_v59 }
 0x2cf   :  { %2413 = vmatpush3.msra.mxu0 %v1913_v60  ;;  %2448 = vmatpush3.msra.mxu1 %v1913_v60  ;;  %v2004_v47 = vpop.f32.mrf.mxu0  ;;  %v2039_v48 = vpop.f32.mrf.mxu1 }
 0x2d0   :  { %2414 = vmatprep.subr.mxu0 %v1928_v61  ;;  %2449 = vmatprep.subr.mxu1 %v1928_v61 }
 0x2d1   :  { %2415 = vmatpush3.msra.mxu0 %v1912_v62  ;;  %2450 = vmatpush3.msra.mxu1 %v1912_v62  ;;  %v2005_v49 = vpop.f32.mrf.mxu0  ;;  %v2040_v50 = vpop.f32.mrf.mxu1 }
 0x2d2   :  { %2416 = vmatprep.subr.mxu0 %v1927_v63  ;;  %2451 = vmatprep.subr.mxu1 %v1927_v63 }
 0x2d3   :  { %2417 = vmatpush3.msra.mxu0 %v1911_v0  ;;  %2452 = vmatpush3.msra.mxu1 %v1911_v0 }
 0x2d4   :  { %2418 = vmatprep.subr.mxu0 %v1926_v1  ;;  %2453 = vmatprep.subr.mxu1 %v1926_v1 }
 0x2d5   :  { %2419 = vmatpush3.msra.mxu0 %v1910_v2  ;;  %2454 = vmatpush3.msra.mxu1 %v1910_v2 }
 0x2d6   :  { %2420 = vmatprep.subr.mxu0 %v1925_v3  ;;  %2455 = vmatprep.subr.mxu1 %v1925_v3  ;;  %v2006_v3 = vadd.f32 %v2005_v49, %v2004_v47 }
 0x2d7   :  { %2421 = vmatpush3.msra.mxu0 %v1909_v4  ;;  %2456 = vmatpush3.msra.mxu1 %v1909_v4  ;;  %v2041_v4 = vadd.f32 %v2040_v50, %v2039_v48 }
 0x2d8   :  { %2422 = vmatprep.subr.mxu0 %v1924_v5  ;;  %2457 = vmatprep.subr.mxu1 %v1924_v5  ;;  %v247_v5 = vld [vmem:[%s3518_s6] sm:$0x1]  ;;  %s2571_s6 = smov [#allocation2]  }
 0x2d9   :  { %2423 = vmatpush3.msra.mxu0 %v1908_v6  ;;  %2458 = vmatpush3.msra.mxu1 %v1908_v6  ;;  %s1738_s23 = sshll.u32 %s2571_s6, 4  ;;  %s1739_s23 = int_to_ptr.vmem [resolvable:$true] %s1738_s23 }
 0x2da   :  { %1443 = vmatmul.mubr.f32.vlgmr.msra.gmra.mxu0 %v1374_v7  ;;  %1518 = vmatmul.mubr.f32.vlgmr.msra.gmra.mxu1 %v1449_v8  ;;  %s2547_s24 = scalar_lea.vmem %s1739_s23, 32  ;;  %p2552_p1 = scmp.lt.s32.totalorder %s1739_s23, %s1739_s23 }
 0x2db   :  { %2462 = vmatprep.subr.mxu0 %v1971_v9  ;;  %2497 = vmatprep.subr.mxu1 %v1971_v9  ;;  %p2548_p0 = scmp.ne.s32.totalorder %s1739_s23, %s2547_s24  ;;  %p2553_p2 = scmp.lt.s32.totalorder %s2547_s24, %s2547_s24 }
 0x2dc   :  { %2463 = vmatpush3.msra.mxu0 %v1955_v10  ;;  %1625 = vmatprep.mubr.f32.mxu0 %v1558_v11  ;;  %v421_v11 = vadd.f32 %v2041_v4, %v247_v5 }
 0x2dd   :  { %2498 = vmatpush3.msra.mxu1 %v1955_v10  ;;  %1700 = vmatprep.mubr.f32.mxu1 %v1633_v12  ;;  %v350_v10 = vadd.f32 %v2006_v3, %v247_v5  ;;  %p2554_p3 = por %p2553_p2, %p2552_p1 }
 0x2de   :  { %2464 = vmatprep.subr.mxu0 %v1970_v13  ;;  %2499 = vmatprep.subr.mxu1 %v1970_v13 }
 0x2df   :  { %2465 = vmatpush3.msra.mxu0 %v1954_v14  ;;  %2500 = vmatpush3.msra.mxu1 %v1954_v14  ;;  %p2555_p4 = pnand %p2554_p3, %p2548_p0 }
 0x2e0   :  { %2466 = vmatprep.subr.mxu0 %v1969_v35  ;;  %2501 = vmatprep.subr.mxu1 %v1969_v35 }
 0x2e1   :  { %2467 = vmatpush3.msra.mxu0 %v1953_v37  ;;  %2502 = vmatpush3.msra.mxu1 %v1953_v37 }
 0x2e2   :  { %2468 = vmatprep.subr.mxu0 %v1968_v15  ;;  %2503 = vmatprep.subr.mxu1 %v1968_v15 }
 0x2e3   :  { %2469 = vmatpush3.msra.mxu0 %v1952_v16  ;;  %2504 = vmatpush3.msra.mxu1 %v1952_v16 }
 0x2e4   :  { %2470 = vmatprep.subr.mxu0 %v1967_v17  ;;  %2505 = vmatprep.subr.mxu1 %v1967_v17 }
 0x2e5   :  { %2471 = vmatpush3.msra.mxu0 %v1951_v18  ;;  %2506 = vmatpush3.msra.mxu1 %v1951_v18 }
 0x2e6   :  { %2472 = vmatprep.subr.mxu0 %v1966_v19  ;;  %2507 = vmatprep.subr.mxu1 %v1966_v19 }
 0x2e7   :  { %2473 = vmatpush3.msra.mxu0 %v1950_v20  ;;  %2508 = vmatpush3.msra.mxu1 %v1950_v20 }
 0x2e8   :  { %2474 = vmatprep.subr.mxu0 %v1965_v21  ;;  %2509 = vmatprep.subr.mxu1 %v1965_v21 }
 0x2e9   :  { %2475 = vmatpush3.msra.mxu0 %v1949_v22  ;;  %2510 = vmatpush3.msra.mxu1 %v1949_v22 }
 0x2ea   :  { %2476 = vmatprep.subr.mxu0 %v1964_v23  ;;  %2511 = vmatprep.subr.mxu1 %v1964_v23 }
 0x2eb   :  { %2477 = vmatpush3.msra.mxu0 %v1948_v24  ;;  %2512 = vmatpush3.msra.mxu1 %v1948_v24 }
 0x2ec   :  { %2478 = vmatprep.subr.mxu0 %v1963_v25  ;;  %2513 = vmatprep.subr.mxu1 %v1963_v25 }
 0x2ed   :  { %2479 = vmatpush3.msra.mxu0 %v1947_v26  ;;  %2514 = vmatpush3.msra.mxu1 %v1947_v26 }
 0x2ee   :  { %2480 = vmatprep.subr.mxu0 %v1962_v27  ;;  %2515 = vmatprep.subr.mxu1 %v1962_v27 }
 0x2ef   :  { %2481 = vmatpush3.msra.mxu0 %v1946_v28  ;;  %2516 = vmatpush3.msra.mxu1 %v1946_v28 }
 0x2f0   :  { %2482 = vmatprep.subr.mxu0 %v1961_v29  ;;  %2517 = vmatprep.subr.mxu1 %v1961_v29  ;;  %v2074_v51 = vpop.f32.mrf.mxu0  ;;  %v2109_v52 = vpop.f32.mrf.mxu1 }
 0x2f1   :  { %2483 = vmatpush3.msra.mxu0 %v1945_v30  ;;  %2518 = vmatpush3.msra.mxu1 %v1945_v30 }
 0x2f2   :  { %2484 = vmatprep.subr.mxu0 %v1960_v31  ;;  %2519 = vmatprep.subr.mxu1 %v1960_v31  ;;  %v2075_v53 = vpop.f32.mrf.mxu0  ;;  %v2110_v54 = vpop.f32.mrf.mxu1 }
 0x2f3   :  { %2485 = vmatpush3.msra.mxu0 %v1944_v32  ;;  %2520 = vmatpush3.msra.mxu1 %v1944_v32  ;;  %v2076_v6 = vadd.f32 %v2075_v53, %v2074_v51  ;;  %v2111_v7 = vadd.f32 %v2110_v54, %v2109_v52 }
 0x2f4   :  { %2486 = vmatprep.subr.mxu0 %v1959_v33  ;;  %2521 = vmatprep.subr.mxu1 %v1959_v33 }
 0x2f5   :  { %2487 = vmatpush3.msra.mxu0 %v1943_v38  ;;  %2522 = vmatpush3.msra.mxu1 %v1943_v38  ;;  %v531_v37 = vadd.f32 %v2076_v6, %v350_v10  ;;  %v608_v15 = vadd.f32 %v2111_v7, %v421_v11 }
 0x2f6   :  { %2488 = vmatprep.subr.mxu0 %v1958_v39  ;;  %2523 = vmatprep.subr.mxu1 %v1958_v39 }
 0x2f7   :  { %2489 = vmatpush3.msra.mxu0 %v1942_v40  ;;  %2524 = vmatpush3.msra.mxu1 %v1942_v40 }
 0x2f8   :  { %2490 = vmatprep.subr.mxu0 %v1957_v41  ;;  %2525 = vmatprep.subr.mxu1 %v1957_v41 }
 0x2f9   :  { %2491 = vmatpush3.msra.mxu0 %v1941_v42  ;;  %2526 = vmatpush3.msra.mxu1 %v1941_v42 }
 0x2fa   :  { %2492 = vmatprep.subr.mxu0 %v1956_v43  ;;  %2527 = vmatprep.subr.mxu1 %v1956_v43 }
 0x2fb   :  { %2493 = vmatpush3.msra.mxu0 %v1940_v44  ;;  %2528 = vmatpush3.msra.mxu1 %v1940_v44 }
 0x2fc   :  { %1626 = vmatmul.mubr.f32.vlgmr.msra.gmra.mxu0 %v1557_v45  ;;  %1701 = vmatmul.mubr.f32.vlgmr.msra.gmra.mxu1 %v1632_v46 }
 0x312   :  { %v2144_v55 = vpop.f32.mrf.mxu0  ;;  %v2179_v56 = vpop.f32.mrf.mxu1 }
 0x314   :  { %v2145_v57 = vpop.f32.mrf.mxu0  ;;  %v2180_v58 = vpop.f32.mrf.mxu1 }
 0x315   :  { %v2146_v12 = vadd.f32 %v2145_v57, %v2144_v55  ;;  %v2181_v13 = vadd.f32 %v2180_v58, %v2179_v56 }
 0x317   :  { %v716_v18 = vadd.f32 %v2146_v12, %v531_v37  ;;  %v791_v19 = vadd.f32 %v2181_v13, %v608_v15 }
 0x334   :  { %v2214_v59 = vpop.f32.mrf.mxu0  ;;  %v2249_v34 = vpop.f32.mrf.mxu1 }
 0x336   :  { %v2215_v60 = vpop.f32.mrf.mxu0  ;;  %v2250_v36 = vpop.f32.mrf.mxu1 }
 0x337   :  { %v2216_v16 = vadd.f32 %v2215_v60, %v2214_v59  ;;  %v2251_v17 = vadd.f32 %v2250_v36, %v2249_v34 }
 0x339   :  { %v899_v24 = vadd.f32 %v2216_v16, %v716_v18  ;;  %v974_v25 = vadd.f32 %v2251_v17, %v791_v19 }
 0x356   :  { %v2284_v61 = vpop.f32.mrf.mxu0  ;;  %v2319_v62 = vpop.f32.mrf.mxu1 }
 0x358   :  { %v2285_v63 = vpop.f32.mrf.mxu0  ;;  %v2320_v0 = vpop.f32.mrf.mxu1 }
 0x359   :  { %v2286_v20 = vadd.f32 %v2285_v63, %v2284_v61  ;;  %v2321_v21 = vadd.f32 %v2320_v0, %v2319_v62 }
 0x35b   :  { %v1082_v28 = vadd.f32 %v2286_v20, %v899_v24  ;;  %v1157_v29 = vadd.f32 %v2321_v21, %v974_v25 }
 0x378   :  { %v2354_v1 = vpop.f32.mrf.mxu0  ;;  %v2389_v2 = vpop.f32.mrf.mxu1 }
 0x37a   :  { %v2355_v8 = vpop.f32.mrf.mxu0  ;;  %v2390_v9 = vpop.f32.mrf.mxu1 }
 0x37b   :  { %v2356_v26 = vadd.f32 %v2355_v8, %v2354_v1  ;;  %v2391_v27 = vadd.f32 %v2390_v9, %v2389_v2 }
 0x37d   :  { %v1265_v38 = vadd.f32 %v2356_v26, %v1082_v28  ;;  %v1340_v39 = vadd.f32 %v2391_v27, %v1157_v29 }
 0x39a   :  { %v2424_v14 = vpop.f32.mrf.mxu0  ;;  %v2459_v35 = vpop.f32.mrf.mxu1 }
 0x39c   :  { %v2425_v22 = vpop.f32.mrf.mxu0  ;;  %v2460_v23 = vpop.f32.mrf.mxu1 }
 0x39d   :  { %v2426_v30 = vadd.f32 %v2425_v22, %v2424_v14  ;;  %v2461_v31 = vadd.f32 %v2460_v23, %v2459_v35 }
 0x39f   :  { %v1448_v42 = vadd.f32 %v2426_v30, %v1265_v38  ;;  %v1523_v43 = vadd.f32 %v2461_v31, %v1340_v39 }
 0x3bc   :  { %v2494_v32 = vpop.f32.mrf.mxu0  ;;  %v2529_v33 = vpop.f32.mrf.mxu1 }
 0x3be   :  { %v2495_v40 = vpop.f32.mrf.mxu0  ;;  %v2530_v41 = vpop.f32.mrf.mxu1 }
 0x3bf   :  { %v2496_v44 = vadd.f32 %v2495_v40, %v2494_v32  ;;  %v2531_v45 = vadd.f32 %v2530_v41, %v2529_v33 }
 0x3c1   :  { %v1706_v46 = vadd.f32 %v2531_v45, %v1523_v43  ;;  %v1631_v47 = vadd.f32 %v2496_v44, %v1448_v42 }
 0x3c3   :  { %v1720_v48 = vsel %vm1707_vm1, %v1706_v46, -inf  ;;  %v1708_v49 = vsel %vm1707_vm1, %v1631_v47, -inf }
 0x3c4   :  { %1721 = vmax.xlane.f32.xlu0 %v1720_v48  ;;  %1709 = vmax.xlane.f32.xlu1 %v1708_v49 }
 0x44d   :  { %v1722_v50 = vpop.xlane.xlu0 %1721  ;;  %v1710_v51 = vpop.xlane.xlu1 %1709 }
 0x44e   :  { %v1723_v52 = vsub.f32 %v1706_v46, %v1722_v50  ;;  %v1711_v53 = vsub.f32 %v1631_v47, %v1710_v51 }
 0x450   :  { %v1712_v54 = vmul.f32 1.442695, %v1711_v53  ;;  %v1724_v55 = vmul.f32 1.442695, %v1723_v52 }
 0x452   :  { %2539 = vpow2.f32 %v1712_v54 }
 0x453   :  { %2541 = vpow2.f32 %v1724_v55 }
 0x45f   :  { %v2540_v56 = vpop.eup %2539 }
 0x460   :  { %v1714_v57 = vsel %vm1707_vm1, %v2540_v56, 0.0  ;;  %v2542_v58 = vpop.eup %2541 }
 0x461   :  { %1715 = vadd.xlane.f32.xlu0 %v1714_v57  ;;  %v1726_v59 = vsel %vm1707_vm1, %v2542_v58, 0.0 }
 0x465   :  { %1727 = vadd.xlane.f32.xlu0 %v1726_v59 }
 0x4ea   :  { %v1716_v34 = vpop.xlane.xlu0 %1715 }
 0x4eb   :  { %2543 = vrcp.f32 %v1716_v34 }
 0x4ee   :  { %v1728_v60 = vpop.xlane.xlu0 %1727 }
 0x4ef   :  { %2545 = vrcp.f32 %v1728_v60 }
 0x4f8   :  { %v2544_v36 = vpop.eup %2543 }
 0x4f9   :  { %v1718_v61 = vmul.f32 %v2544_v36, %v2540_v56 }
 0x4fb   :  { %1719 = vst.msk [vmem:[#allocation2] sm:$0x1] %vm1707_vm1, %v1718_v61 }
 0x4fc   :  { %v2546_v62 = vpop.eup %2545 }
 0x4fd   :  { %v1730_v63 = vmul.f32 %v2546_v62, %v2542_v58 }
 0x4ff   :  { %1731 = vst.msk [vmem:[#allocation2 + $0x1] sm:$0x1] %vm1707_vm1, %v1730_v63 }
 0x500   :  { %2558 = shalt.err (!%p2555_p4)
}
 0x501   :  { %1741 = dma.vmem_to_hbm [thread:$0]  %s1739_s23, 32, %s3519_s7, [#allocation3]  }
 0x502   :  { %2567 = dma.done.wait [#allocation3], 32  }
 0x503   :  { %2568 = vsyncadd [#allocation3], 4294967264 }
 0x504   :  { %1745 = vsyncpa [#allocation3], 1 }

</bundles_post_ra>
